<compile_context>
chip_gen: v5e
topology: v5e:2x2
jax: 0.10.0
libtpu: 0.0.40
codegen_flags: <defaults>
</compile_context>

<pallas_src>
import jax
import jax.numpy as jnp
from jax.experimental import pallas as pl

LANE = 128  # TPU lane width; all padded N/K dims are multiples of this.


def _round_up(x, m):
    return (x + m - 1) // m * m


# ----------------------------------------------------------------------------
# Pallas kernels
# ----------------------------------------------------------------------------
def _conv_relu_pool_kernel(p_ref, w_ref, b_ref, o_ref):
    """Fused conv(matmul) + bias + ReLU + 2x2 maxpool.

    p_ref: (4, Mp, Kpad)  im2col patches grouped by pool tap (di*2+dj)
    w_ref: (Kpad, 128)    zero-padded weight matrix
    b_ref: (1, 128)       zero-padded bias
    o_ref: (Mp, 128)      pooled output, rows in (n, po, qo) order
    """
    w = w_ref[...]
    b = b_ref[...]

    def tap(t):
        y = jnp.dot(p_ref[t], w, preferred_element_type=jnp.float32) + b
        return jnp.maximum(y, 0.0)

    o_ref[...] = jnp.maximum(jnp.maximum(tap(0), tap(1)),
                             jnp.maximum(tap(2), tap(3)))


def _fc_stack_kernel(x_ref, w1_ref, b1_ref, w2_ref, b2_ref, w3_ref, b3_ref,
                     o_ref):
    """fc1 -> ReLU -> fc2 -> ReLU -> fc3, all intermediates stay in VMEM."""
    h = jnp.dot(x_ref[...], w1_ref[...],
                preferred_element_type=jnp.float32) + b1_ref[...]
    h = jnp.maximum(h, 0.0)
    h = jnp.dot(h, w2_ref[...],
                preferred_element_type=jnp.float32) + b2_ref[...]
    h = jnp.maximum(h, 0.0)
    o_ref[...] = jnp.dot(h, w3_ref[...],
                         preferred_element_type=jnp.float32) + b3_ref[...]


# ----------------------------------------------------------------------------
# Wrappers (single-block: all operands fit comfortably in VMEM at these sizes;
# at much larger batch the Mp axis would be tiled with a 'parallel' grid dim)
# ----------------------------------------------------------------------------
def conv_relu_pool(x_nhwc, w_pad, b_pad, kh, kw, cout):
    """maxpool2x2(relu(conv_valid(x))) for NHWC input. Returns NHWC."""
    N, H, W, C = x_nhwc.shape
    Ho, Wo = H - kh + 1, W - kw + 1
    Po, Qo = Ho // 2, Wo // 2
    K = kh * kw * C
    Kpad = w_pad.shape[0]
    Mp = N * Po * Qo

    # im2col glue (XLA): K-axis ordering is (kh, kw, cin), matching the
    # weight prep below.  Patch extraction stays outside the kernel (cheap at
    # these sizes); the kernel sees the patches already grouped by pool tap.
    cols = [x_nhwc[:, i:i + Ho, j:j + Wo, :]
            for i in range(kh) for j in range(kw)]
    patches = jnp.concatenate(cols, axis=-1)              # (N, Ho, Wo, K)
    taps = patches.reshape(N, Po, 2, Qo, 2, K)            # ho=2*po+di, wo=2*qo+dj
    taps = jnp.transpose(taps, (2, 4, 0, 1, 3, 5)).reshape(4, Mp, K)
    taps = jnp.pad(taps, ((0, 0), (0, 0), (0, Kpad - K)))

    flops = 2 * 4 * Mp * Kpad * LANE
    bytes_accessed = 4 * (taps.size + w_pad.size + b_pad.size + Mp * LANE)
    out = pl.pallas_call(
        _conv_relu_pool_kernel,
        out_shape=jax.ShapeDtypeStruct((Mp, LANE), jnp.float32),
        cost_estimate=pl.CostEstimate(flops=flops, transcendentals=0,
                                      bytes_accessed=bytes_accessed),
    )(taps, w_pad, b_pad)
    # Padded lanes are exactly zero (zero weight cols + zero bias + ReLU);
    # slice back to the true channel count.
    return out.reshape(N, Po, Qo, LANE)[..., :cout]


def fc_stack(x, fcw):
    """Fused fc1(ReLU) -> fc2(ReLU) -> fc3. x: (N, 400). Returns (N, 10)."""
    N, K = x.shape
    Kpad = fcw["w1"].shape[0]
    x_pad = jnp.pad(x, ((0, 0), (0, Kpad - K)))

    flops = 2 * N * (Kpad * LANE + LANE * LANE + LANE * LANE)
    w_bytes = sum(int(v.size) for v in fcw.values())
    bytes_accessed = 4 * (x_pad.size + w_bytes + N * LANE)
    out = pl.pallas_call(
        _fc_stack_kernel,
        out_shape=jax.ShapeDtypeStruct((N, LANE), jnp.float32),
        cost_estimate=pl.CostEstimate(flops=flops, transcendentals=0,
                                      bytes_accessed=bytes_accessed),
    )(x_pad, fcw["w1"], fcw["b1"], fcw["w2"], fcw["b2"], fcw["w3"], fcw["b3"])
    return out[:, :10]


# ----------------------------------------------------------------------------
# Parameters: PyTorch-shaped init + one-time padded/transposed layout prep
# ----------------------------------------------------------------------------
def init_params(key):
    ks = jax.random.split(key, 10)

    def u(k, shape, fan_in):
        bound = 1.0 / jnp.sqrt(fan_in)
        return jax.random.uniform(k, shape, jnp.float32, -bound, bound)

    return {
        "conv1_w": u(ks[0], (6, 3, 5, 5), 3 * 5 * 5),
        "conv1_b": u(ks[1], (6,), 3 * 5 * 5),
        "conv2_w": u(ks[2], (16, 6, 5, 5), 6 * 5 * 5),
        "conv2_b": u(ks[3], (16,), 6 * 5 * 5),
        "fc1_w": u(ks[4], (120, 400), 400),   # PyTorch Linear: (out, in)
        "fc1_b": u(ks[5], (120,), 400),
        "fc2_w": u(ks[6], (84, 120), 120),
        "fc2_b": u(ks[7], (84,), 120),
        "fc3_w": u(ks[8], (10, 84), 84),
        "fc3_b": u(ks[9], (10,), 84),
    }


def _pad2d(a, rows, cols):
    return jnp.pad(a, ((0, rows - a.shape[0]), (0, cols - a.shape[1])))


def prepare_params(params):
    """One-time layout prep (kept out of the forward hot path):
    conv OIHW -> (kh*kw*cin, 128) zero-padded; fc (out,in) -> (in_pad, 128)
    zero-padded; biases -> (1, 128) zero-padded."""
    def conv_w(w_oihw):
        o, i, kh, kw = w_oihw.shape
        k = kh * kw * i
        wm = jnp.transpose(w_oihw, (2, 3, 1, 0)).reshape(k, o)  # (kh,kw,in,out)
        return _pad2d(wm, _round_up(k, LANE), LANE)

    def fc_w(w_oi):
        o, i = w_oi.shape
        return _pad2d(w_oi.T, _round_up(i, LANE), LANE)

    def bias(b):
        return _pad2d(b.reshape(1, -1), 1, LANE)

    return {
        "conv1_w": conv_w(params["conv1_w"]), "conv1_b": bias(params["conv1_b"]),
        "conv2_w": conv_w(params["conv2_w"]), "conv2_b": bias(params["conv2_b"]),
        "fc": {
            "w1": fc_w(params["fc1_w"]), "b1": bias(params["fc1_b"]),
            "w2": fc_w(params["fc2_w"]), "b2": bias(params["fc2_b"]),
            "w3": fc_w(params["fc3_w"]), "b3": bias(params["fc3_b"]),
        },
    }


# ----------------------------------------------------------------------------
# Full forward (matches CIFAR10_CNN.forward)
# ----------------------------------------------------------------------------
@jax.jit
def cifar10_cnn_forward(x_nchw, prep):
    x = jnp.transpose(x_nchw, (0, 2, 3, 1))                       # NCHW -> NHWC
    x = conv_relu_pool(x, prep["conv1_w"], prep["conv1_b"], 5, 5, cout=6)   # (N,14,14,6)
    x = conv_relu_pool(x, prep["conv2_w"], prep["conv2_b"], 5, 5, cout=16)  # (N,5,5,16)
    # PyTorch flattens in NCHW order: x.view(-1, 16*5*5)
    x = jnp.transpose(x, (0, 3, 1, 2)).reshape(x.shape[0], 16 * 5 * 5)
    return fc_stack(x, prep["fc"])                                # (N, 10)


if __name__ == "__main__":
    key = jax.random.PRNGKey(0)
    k_x, k_p = jax.random.split(key)
    # Spatial/channel dims are fixed by the module (32x32x3 is required so the
    # flatten produces 16*5*5 = 400 features); batch kept small.
    x = jax.random.normal(k_x, (2, 3, 32, 32), jnp.float32)
    params = init_params(k_p)
    prep = prepare_params(params)   # one-time weight layout prep
    out = cifar10_cnn_forward(x, prep)
    out = jax.block_until_ready(out)
    assert out.shape == (2, 10)
    print("KERNEL_OK")
</pallas_src>

<mosaic_0001>
module attributes {stable_mosaic.version = 11 : i64} {
  func.func @_conv_relu_pool_kernel(%arg0: memref<4x392x128xf32, #tpu.memory_space<vmem>>, %arg1: memref<128x128xf32, #tpu.memory_space<vmem>>, %arg2: memref<1x128xf32, #tpu.memory_space<vmem>>, %arg3: memref<392x128xf32, #tpu.memory_space<vmem>>) attributes {dimension_semantics = [], scalar_prefetch = 0 : i64, scratch_operands = 0 : i64, tpu.core_type = #tpu.core_type<tc>} {
    %c0 = arith.constant 0 : index
    %c0_0 = arith.constant 0 : index
    %0 = vector.load %arg1[%c0, %c0_0] : memref<128x128xf32, #tpu.memory_space<vmem>>, vector<128x128xf32>
    %c0_1 = arith.constant 0 : index
    %c0_2 = arith.constant 0 : index
    %1 = vector.load %arg2[%c0_1, %c0_2] : memref<1x128xf32, #tpu.memory_space<vmem>>, vector<1x128xf32>
    %c0_3 = arith.constant 0 : index
    %c0_4 = arith.constant 0 : index
    %c0_5 = arith.constant 0 : index
    %2 = vector.load %arg0[%c0_3, %c0_4, %c0_5] : memref<4x392x128xf32, #tpu.memory_space<vmem>>, vector<1x392x128xf32>
    %3 = vector.shape_cast %2 : vector<1x392x128xf32> to vector<392x128xf32>
    %cst = arith.constant dense<0.000000e+00> : vector<392x128xf32>
    %4 = tpu.matmul %3, %0, %cst {dimension_numbers = #tpu.dot_dimension_numbers<[1], [0], [0], [1], [0, 0, 1, 1], [], []>} : vector<392x128xf32>, vector<128x128xf32>, vector<392x128xf32> -> vector<392x128xf32>
    %5 = vector.broadcast %1 : vector<1x128xf32> to vector<392x128xf32>
    %6 = arith.addf %4, %5 : vector<392x128xf32>
    %cst_6 = arith.constant 0.000000e+00 : f32
    %7 = vector.broadcast %cst_6 : f32 to vector<392x128xf32>
    %8 = arith.maximumf %6, %7 : vector<392x128xf32>
    %c1 = arith.constant 1 : index
    %c0_7 = arith.constant 0 : index
    %c0_8 = arith.constant 0 : index
    %9 = vector.load %arg0[%c1, %c0_7, %c0_8] : memref<4x392x128xf32, #tpu.memory_space<vmem>>, vector<1x392x128xf32>
    %10 = vector.shape_cast %9 : vector<1x392x128xf32> to vector<392x128xf32>
    %cst_9 = arith.constant dense<0.000000e+00> : vector<392x128xf32>
    %11 = tpu.matmul %10, %0, %cst_9 {dimension_numbers = #tpu.dot_dimension_numbers<[1], [0], [0], [1], [0, 0, 1, 1], [], []>} : vector<392x128xf32>, vector<128x128xf32>, vector<392x128xf32> -> vector<392x128xf32>
    %12 = vector.broadcast %1 : vector<1x128xf32> to vector<392x128xf32>
    %13 = arith.addf %11, %12 : vector<392x128xf32>
    %cst_10 = arith.constant 0.000000e+00 : f32
    %14 = vector.broadcast %cst_10 : f32 to vector<392x128xf32>
    %15 = arith.maximumf %13, %14 : vector<392x128xf32>
    %16 = arith.maximumf %8, %15 : vector<392x128xf32>
    %c2 = arith.constant 2 : index
    %c0_11 = arith.constant 0 : index
    %c0_12 = arith.constant 0 : index
    %17 = vector.load %arg0[%c2, %c0_11, %c0_12] : memref<4x392x128xf32, #tpu.memory_space<vmem>>, vector<1x392x128xf32>
    %18 = vector.shape_cast %17 : vector<1x392x128xf32> to vector<392x128xf32>
    %cst_13 = arith.constant dense<0.000000e+00> : vector<392x128xf32>
    %19 = tpu.matmul %18, %0, %cst_13 {dimension_numbers = #tpu.dot_dimension_numbers<[1], [0], [0], [1], [0, 0, 1, 1], [], []>} : vector<392x128xf32>, vector<128x128xf32>, vector<392x128xf32> -> vector<392x128xf32>
    %20 = vector.broadcast %1 : vector<1x128xf32> to vector<392x128xf32>
    %21 = arith.addf %19, %20 : vector<392x128xf32>
    %cst_14 = arith.constant 0.000000e+00 : f32
    %22 = vector.broadcast %cst_14 : f32 to vector<392x128xf32>
    %23 = arith.maximumf %21, %22 : vector<392x128xf32>
    %c3 = arith.constant 3 : index
    %c0_15 = arith.constant 0 : index
    %c0_16 = arith.constant 0 : index
    %24 = vector.load %arg0[%c3, %c0_15, %c0_16] : memref<4x392x128xf32, #tpu.memory_space<vmem>>, vector<1x392x128xf32>
    %25 = vector.shape_cast %24 : vector<1x392x128xf32> to vector<392x128xf32>
    %cst_17 = arith.constant dense<0.000000e+00> : vector<392x128xf32>
    %26 = tpu.matmul %25, %0, %cst_17 {dimension_numbers = #tpu.dot_dimension_numbers<[1], [0], [0], [1], [0, 0, 1, 1], [], []>} : vector<392x128xf32>, vector<128x128xf32>, vector<392x128xf32> -> vector<392x128xf32>
    %27 = vector.broadcast %1 : vector<1x128xf32> to vector<392x128xf32>
    %28 = arith.addf %26, %27 : vector<392x128xf32>
    %cst_18 = arith.constant 0.000000e+00 : f32
    %29 = vector.broadcast %cst_18 : f32 to vector<392x128xf32>
    %30 = arith.maximumf %28, %29 : vector<392x128xf32>
    %31 = arith.maximumf %23, %30 : vector<392x128xf32>
    %32 = arith.maximumf %16, %31 : vector<392x128xf32>
    %c0_19 = arith.constant 0 : index
    %c0_20 = arith.constant 0 : index
    %33 = vector.load %arg3[%c0_19, %c0_20] : memref<392x128xf32, #tpu.memory_space<vmem>>, vector<392x128xf32>
    tpu.vector_store %arg3[%c0_19, %c0_20], %32 {strides = array<i32>} : memref<392x128xf32, #tpu.memory_space<vmem>>, vector<392x128xf32>,
    return
  }
}

module attributes {stable_mosaic.version = 11 : i64} {
  func.func @_conv_relu_pool_kernel(%arg0: memref<4x50x256xf32, #tpu.memory_space<vmem>>, %arg1: memref<256x128xf32, #tpu.memory_space<vmem>>, %arg2: memref<1x128xf32, #tpu.memory_space<vmem>>, %arg3: memref<50x128xf32, #tpu.memory_space<vmem>>) attributes {dimension_semantics = [], scalar_prefetch = 0 : i64, scratch_operands = 0 : i64, tpu.core_type = #tpu.core_type<tc>} {
    %c0 = arith.constant 0 : index
    %c0_0 = arith.constant 0 : index
    %0 = vector.load %arg1[%c0, %c0_0] : memref<256x128xf32, #tpu.memory_space<vmem>>, vector<256x128xf32>
    %c0_1 = arith.constant 0 : index
    %c0_2 = arith.constant 0 : index
    %1 = vector.load %arg2[%c0_1, %c0_2] : memref<1x128xf32, #tpu.memory_space<vmem>>, vector<1x128xf32>
    %c0_3 = arith.constant 0 : index
    %c0_4 = arith.constant 0 : index
    %c0_5 = arith.constant 0 : index
    %2 = vector.load %arg0[%c0_3, %c0_4, %c0_5] : memref<4x50x256xf32, #tpu.memory_space<vmem>>, vector<1x50x256xf32>
    %3 = vector.shape_cast %2 : vector<1x50x256xf32> to vector<50x256xf32>
    %cst = arith.constant dense<0.000000e+00> : vector<50x128xf32>
    %4 = tpu.matmul %3, %0, %cst {dimension_numbers = #tpu.dot_dimension_numbers<[1], [0], [0], [1], [0, 0, 1, 1], [], []>} : vector<50x256xf32>, vector<256x128xf32>, vector<50x128xf32> -> vector<50x128xf32>
    %5 = vector.broadcast %1 : vector<1x128xf32> to vector<50x128xf32>
    %6 = arith.addf %4, %5 : vector<50x128xf32>
    %cst_6 = arith.constant 0.000000e+00 : f32
    %7 = vector.broadcast %cst_6 : f32 to vector<50x128xf32>
    %8 = arith.maximumf %6, %7 : vector<50x128xf32>
    %c1 = arith.constant 1 : index
    %c0_7 = arith.constant 0 : index
    %c0_8 = arith.constant 0 : index
    %9 = vector.load %arg0[%c1, %c0_7, %c0_8] : memref<4x50x256xf32, #tpu.memory_space<vmem>>, vector<1x50x256xf32>
    %10 = vector.shape_cast %9 : vector<1x50x256xf32> to vector<50x256xf32>
    %cst_9 = arith.constant dense<0.000000e+00> : vector<50x128xf32>
    %11 = tpu.matmul %10, %0, %cst_9 {dimension_numbers = #tpu.dot_dimension_numbers<[1], [0], [0], [1], [0, 0, 1, 1], [], []>} : vector<50x256xf32>, vector<256x128xf32>, vector<50x128xf32> -> vector<50x128xf32>
    %12 = vector.broadcast %1 : vector<1x128xf32> to vector<50x128xf32>
    %13 = arith.addf %11, %12 : vector<50x128xf32>
    %cst_10 = arith.constant 0.000000e+00 : f32
    %14 = vector.broadcast %cst_10 : f32 to vector<50x128xf32>
    %15 = arith.maximumf %13, %14 : vector<50x128xf32>
    %16 = arith.maximumf %8, %15 : vector<50x128xf32>
    %c2 = arith.constant 2 : index
    %c0_11 = arith.constant 0 : index
    %c0_12 = arith.constant 0 : index
    %17 = vector.load %arg0[%c2, %c0_11, %c0_12] : memref<4x50x256xf32, #tpu.memory_space<vmem>>, vector<1x50x256xf32>
    %18 = vector.shape_cast %17 : vector<1x50x256xf32> to vector<50x256xf32>
    %cst_13 = arith.constant dense<0.000000e+00> : vector<50x128xf32>
    %19 = tpu.matmul %18, %0, %cst_13 {dimension_numbers = #tpu.dot_dimension_numbers<[1], [0], [0], [1], [0, 0, 1, 1], [], []>} : vector<50x256xf32>, vector<256x128xf32>, vector<50x128xf32> -> vector<50x128xf32>
    %20 = vector.broadcast %1 : vector<1x128xf32> to vector<50x128xf32>
    %21 = arith.addf %19, %20 : vector<50x128xf32>
    %cst_14 = arith.constant 0.000000e+00 : f32
    %22 = vector.broadcast %cst_14 : f32 to vector<50x128xf32>
    %23 = arith.maximumf %21, %22 : vector<50x128xf32>
    %c3 = arith.constant 3 : index
    %c0_15 = arith.constant 0 : index
    %c0_16 = arith.constant 0 : index
    %24 = vector.load %arg0[%c3, %c0_15, %c0_16] : memref<4x50x256xf32, #tpu.memory_space<vmem>>, vector<1x50x256xf32>
    %25 = vector.shape_cast %24 : vector<1x50x256xf32> to vector<50x256xf32>
    %cst_17 = arith.constant dense<0.000000e+00> : vector<50x128xf32>
    %26 = tpu.matmul %25, %0, %cst_17 {dimension_numbers = #tpu.dot_dimension_numbers<[1], [0], [0], [1], [0, 0, 1, 1], [], []>} : vector<50x256xf32>, vector<256x128xf32>, vector<50x128xf32> -> vector<50x128xf32>
    %27 = vector.broadcast %1 : vector<1x128xf32> to vector<50x128xf32>
    %28 = arith.addf %26, %27 : vector<50x128xf32>
    %cst_18 = arith.constant 0.000000e+00 : f32
    %29 = vector.broadcast %cst_18 : f32 to vector<50x128xf32>
    %30 = arith.maximumf %28, %29 : vector<50x128xf32>
    %31 = arith.maximumf %23, %30 : vector<50x128xf32>
    %32 = arith.maximumf %16, %31 : vector<50x128xf32>
    %c0_19 = arith.constant 0 : index
    %c0_20 = arith.constant 0 : index
    %33 = vector.load %arg3[%c0_19, %c0_20] : memref<50x128xf32, #tpu.memory_space<vmem>>, vector<50x128xf32>
    tpu.vector_store %arg3[%c0_19, %c0_20], %32 {strides = array<i32>} : memref<50x128xf32, #tpu.memory_space<vmem>>, vector<50x128xf32>,
    return
  }
}

module attributes {stable_mosaic.version = 11 : i64} {
  func.func @_fc_stack_kernel(%arg0: memref<2x512xf32, #tpu.memory_space<vmem>>, %arg1: memref<512x128xf32, #tpu.memory_space<vmem>>, %arg2: memref<1x128xf32, #tpu.memory_space<vmem>>, %arg3: memref<128x128xf32, #tpu.memory_space<vmem>>, %arg4: memref<1x128xf32, #tpu.memory_space<vmem>>, %arg5: memref<128x128xf32, #tpu.memory_space<vmem>>, %arg6: memref<1x128xf32, #tpu.memory_space<vmem>>, %arg7: memref<2x128xf32, #tpu.memory_space<vmem>>) attributes {dimension_semantics = [], scalar_prefetch = 0 : i64, scratch_operands = 0 : i64, tpu.core_type = #tpu.core_type<tc>} {
    %c0 = arith.constant 0 : index
    %c0_0 = arith.constant 0 : index
    %0 = vector.load %arg0[%c0, %c0_0] : memref<2x512xf32, #tpu.memory_space<vmem>>, vector<2x512xf32>
    %c0_1 = arith.constant 0 : index
    %c0_2 = arith.constant 0 : index
    %1 = vector.load %arg1[%c0_1, %c0_2] : memref<512x128xf32, #tpu.memory_space<vmem>>, vector<512x128xf32>
    %cst = arith.constant dense<0.000000e+00> : vector<2x128xf32>
    %2 = tpu.matmul %0, %1, %cst {dimension_numbers = #tpu.dot_dimension_numbers<[1], [0], [0], [1], [0, 0, 1, 1], [], []>} : vector<2x512xf32>, vector<512x128xf32>, vector<2x128xf32> -> vector<2x128xf32>
    %c0_3 = arith.constant 0 : index
    %c0_4 = arith.constant 0 : index
    %3 = vector.load %arg2[%c0_3, %c0_4] : memref<1x128xf32, #tpu.memory_space<vmem>>, vector<1x128xf32>
    %4 = vector.broadcast %3 : vector<1x128xf32> to vector<2x128xf32>
    %5 = arith.addf %2, %4 : vector<2x128xf32>
    %cst_5 = arith.constant 0.000000e+00 : f32
    %6 = vector.broadcast %cst_5 : f32 to vector<2x128xf32>
    %7 = arith.maximumf %5, %6 : vector<2x128xf32>
    %c0_6 = arith.constant 0 : index
    %c0_7 = arith.constant 0 : index
    %8 = vector.load %arg3[%c0_6, %c0_7] : memref<128x128xf32, #tpu.memory_space<vmem>>, vector<128x128xf32>
    %cst_8 = arith.constant dense<0.000000e+00> : vector<2x128xf32>
    %9 = tpu.matmul %7, %8, %cst_8 {dimension_numbers = #tpu.dot_dimension_numbers<[1], [0], [0], [1], [0, 0, 1, 1], [], []>} : vector<2x128xf32>, vector<128x128xf32>, vector<2x128xf32> -> vector<2x128xf32>
    %c0_9 = arith.constant 0 : index
    %c0_10 = arith.constant 0 : index
    %10 = vector.load %arg4[%c0_9, %c0_10] : memref<1x128xf32, #tpu.memory_space<vmem>>, vector<1x128xf32>
    %11 = vector.broadcast %10 : vector<1x128xf32> to vector<2x128xf32>
    %12 = arith.addf %9, %11 : vector<2x128xf32>
    %cst_11 = arith.constant 0.000000e+00 : f32
    %13 = vector.broadcast %cst_11 : f32 to vector<2x128xf32>
    %14 = arith.maximumf %12, %13 : vector<2x128xf32>
    %c0_12 = arith.constant 0 : index
    %c0_13 = arith.constant 0 : index
    %15 = vector.load %arg5[%c0_12, %c0_13] : memref<128x128xf32, #tpu.memory_space<vmem>>, vector<128x128xf32>
    %cst_14 = arith.constant dense<0.000000e+00> : vector<2x128xf32>
    %16 = tpu.matmul %14, %15, %cst_14 {dimension_numbers = #tpu.dot_dimension_numbers<[1], [0], [0], [1], [0, 0, 1, 1], [], []>} : vector<2x128xf32>, vector<128x128xf32>, vector<2x128xf32> -> vector<2x128xf32>
    %c0_15 = arith.constant 0 : index
    %c0_16 = arith.constant 0 : index
    %17 = vector.load %arg6[%c0_15, %c0_16] : memref<1x128xf32, #tpu.memory_space<vmem>>, vector<1x128xf32>
    %18 = vector.broadcast %17 : vector<1x128xf32> to vector<2x128xf32>
    %19 = arith.addf %16, %18 : vector<2x128xf32>
    %c0_17 = arith.constant 0 : index
    %c0_18 = arith.constant 0 : index
    %20 = vector.load %arg7[%c0_17, %c0_18] : memref<2x128xf32, #tpu.memory_space<vmem>>, vector<2x128xf32>
    tpu.vector_store %arg7[%c0_17, %c0_18], %19 {strides = array<i32>} : memref<2x128xf32, #tpu.memory_space<vmem>>, vector<2x128xf32>,
    return
  }
}

</mosaic_0001>

<bundles_post_ra>
// kernel: cifar10_cnn_forward.3
= control target key start
LH: loop header
LB: loop body
LE: loop exit
PB: predicated region body
PF: predicated region fallthrough
CT: control target
= control target key end

     0   :  { %s2441_s1 = inlined_call_operand.vmem [shape: f32[128,128], index: 1, kind: input, shape index: {}]   ;;  %s2442_s0 = inlined_call_operand.vmem [shape: f32[4,392,128], index: 0, kind: input, shape index: {}]   ;;  %s2443_s2 = inlined_call_operand.vmem [shape: f32[1,128], index: 2, kind: input, shape index: {}]   ;;  %s2444_s3 = inlined_call_operand.vmem [shape: f32[392,128], index: 3, kind: output, shape index: {}]  }
   0x1   :  { %v29_v0 = vld [vmem:[%s2441_s1 + $0x78] sm:$0xff]  ;;  %v28_v1 = vld [vmem:[%s2441_s1 + $0x70] sm:$0xff]  ;;  %v27_v2 = vld [vmem:[%s2441_s1 + $0x68] sm:$0xff] }
   0x2   :  { %658 = vmatpush.msra.mxu2 %v29_v0  ;;  %921 = vmatpush.msra.mxu3 %v29_v0  ;;  %v26_v3 = vld [vmem:[%s2441_s1 + $0x60] sm:$0xff]  ;;  %v25_v4 = vld [vmem:[%s2441_s1 + $0x58] sm:$0xff]  ;;  %v24_v5 = vld [vmem:[%s2441_s1 + $0x50] sm:$0xff] }
   0x3   :  { %83 = vmatpush.msra.mxu0 %v29_v0  ;;  %346 = vmatpush.msra.mxu1 %v29_v0  ;;  %v23_v6 = vld [vmem:[%s2441_s1 + $0x48] sm:$0xff]  ;;  %v22_v7 = vld [vmem:[%s2441_s1 + $0x40] sm:$0xff]  ;;  %v21_v8 = vld [vmem:[%s2441_s1 + $0x38] sm:$0xff] }
   0x4   :  { %659 = vmatpush.msra.mxu2 %v28_v1  ;;  %922 = vmatpush.msra.mxu3 %v28_v1  ;;  %v20_v9 = vld [vmem:[%s2441_s1 + $0x30] sm:$0xff]  ;;  %v19_v10 = vld [vmem:[%s2441_s1 + $0x28] sm:$0xff]  ;;  %v18_v11 = vld [vmem:[%s2441_s1 + $0x20] sm:$0xff] }
   0x5   :  { %84 = vmatpush.msra.mxu0 %v28_v1  ;;  %347 = vmatpush.msra.mxu1 %v28_v1  ;;  %v17_v12 = vld [vmem:[%s2441_s1 + $0x18] sm:$0xff]  ;;  %v16_v13 = vld [vmem:[%s2441_s1 + $0x10] sm:$0xff]  ;;  %v15_v14 = vld [vmem:[%s2441_s1 + $0x8] sm:$0xff] }
   0x6   :  { %660 = vmatpush.msra.mxu2 %v27_v2  ;;  %923 = vmatpush.msra.mxu3 %v27_v2  ;;  %v14_v15 = vld [vmem:[%s2441_s1] sm:$0xff]  ;;  %v1334_v16 = vld [vmem:[%s2442_s0 + $0x310] sm:$0xff]  ;;  %v1383_v17 = vld [vmem:[%s2442_s0 + $0x498] sm:$0xff] }
   0x7   :  { %85 = vmatpush.msra.mxu0 %v27_v2  ;;  %348 = vmatpush.msra.mxu1 %v27_v2  ;;  %v31_v18 = vld [vmem:[%s2442_s0] sm:$0xff]  ;;  %v1285_v19 = vld [vmem:[%s2442_s0 + $0x188] sm:$0xff]  ;;  %v1335_v20 = vld [vmem:[%s2442_s0 + $0x318] sm:$0xff] }
   0x8   :  { %661 = vmatpush.msra.mxu2 %v26_v3  ;;  %924 = vmatpush.msra.mxu3 %v26_v3  ;;  %v1384_v21 = vld [vmem:[%s2442_s0 + $0x4a0] sm:$0xff]  ;;  %v32_v22 = vld [vmem:[%s2442_s0 + $0x8] sm:$0xff]  ;;  %v1286_v23 = vld [vmem:[%s2442_s0 + $0x190] sm:$0xff] }
   0x9   :  { %86 = vmatpush.msra.mxu0 %v26_v3  ;;  %349 = vmatpush.msra.mxu1 %v26_v3  ;;  %v1336_v24 = vld [vmem:[%s2442_s0 + $0x320] sm:$0xff]  ;;  %v1385_v25 = vld [vmem:[%s2442_s0 + $0x4a8] sm:$0xff]  ;;  %v33_v26 = vld [vmem:[%s2442_s0 + $0x10] sm:$0xff] }
   0xa   :  { %662 = vmatpush.msra.mxu2 %v25_v4  ;;  %925 = vmatpush.msra.mxu3 %v25_v4  ;;  %v1287_v27 = vld [vmem:[%s2442_s0 + $0x198] sm:$0xff]  ;;  %v1337_v28 = vld [vmem:[%s2442_s0 + $0x328] sm:$0xff]  ;;  %v1386_v29 = vld [vmem:[%s2442_s0 + $0x4b0] sm:$0xff] }
   0xb   :  { %87 = vmatpush.msra.mxu0 %v25_v4  ;;  %350 = vmatpush.msra.mxu1 %v25_v4  ;;  %v34_v30 = vld [vmem:[%s2442_s0 + $0x18] sm:$0xff]  ;;  %v1288_v31 = vld [vmem:[%s2442_s0 + $0x1a0] sm:$0xff]  ;;  %v1338_v32 = vld [vmem:[%s2442_s0 + $0x330] sm:$0xff] }
   0xc   :  { %663 = vmatpush.msra.mxu2 %v24_v5  ;;  %926 = vmatpush.msra.mxu3 %v24_v5  ;;  %v1387_v33 = vld [vmem:[%s2442_s0 + $0x4b8] sm:$0xff]  ;;  %v35_v34 = vld [vmem:[%s2442_s0 + $0x20] sm:$0xff]  ;;  %v1289_v35 = vld [vmem:[%s2442_s0 + $0x1a8] sm:$0xff] }
   0xd   :  { %88 = vmatpush.msra.mxu0 %v24_v5  ;;  %351 = vmatpush.msra.mxu1 %v24_v5  ;;  %v1339_v36 = vld [vmem:[%s2442_s0 + $0x338] sm:$0xff]  ;;  %v1388_v37 = vld [vmem:[%s2442_s0 + $0x4c0] sm:$0xff]  ;;  %v36_v38 = vld [vmem:[%s2442_s0 + $0x28] sm:$0xff] }
   0xe   :  { %664 = vmatpush.msra.mxu2 %v23_v6  ;;  %927 = vmatpush.msra.mxu3 %v23_v6  ;;  %v1290_v39 = vld [vmem:[%s2442_s0 + $0x1b0] sm:$0xff]  ;;  %v1340_v40 = vld [vmem:[%s2442_s0 + $0x340] sm:$0xff]  ;;  %v1389_v41 = vld [vmem:[%s2442_s0 + $0x4c8] sm:$0xff] }
   0xf   :  { %89 = vmatpush.msra.mxu0 %v23_v6  ;;  %352 = vmatpush.msra.mxu1 %v23_v6  ;;  %v37_v42 = vld [vmem:[%s2442_s0 + $0x30] sm:$0xff]  ;;  %v1291_v43 = vld [vmem:[%s2442_s0 + $0x1b8] sm:$0xff]  ;;  %v1341_v44 = vld [vmem:[%s2442_s0 + $0x348] sm:$0xff] }
  0x10   :  { %665 = vmatpush.msra.mxu2 %v22_v7  ;;  %928 = vmatpush.msra.mxu3 %v22_v7  ;;  %v1390_v45 = vld [vmem:[%s2442_s0 + $0x4d0] sm:$0xff]  ;;  %v38_v46 = vld [vmem:[%s2442_s0 + $0x38] sm:$0xff]  ;;  %v1292_v47 = vld [vmem:[%s2442_s0 + $0x1c0] sm:$0xff] }
  0x11   :  { %90 = vmatpush.msra.mxu0 %v22_v7  ;;  %353 = vmatpush.msra.mxu1 %v22_v7  ;;  %v1342_v48 = vld [vmem:[%s2442_s0 + $0x350] sm:$0xff]  ;;  %v1391_v49 = vld [vmem:[%s2442_s0 + $0x4d8] sm:$0xff]  ;;  %v39_v50 = vld [vmem:[%s2442_s0 + $0x40] sm:$0xff] }
  0x12   :  { %666 = vmatpush.msra.mxu2 %v21_v8  ;;  %929 = vmatpush.msra.mxu3 %v21_v8  ;;  %v1293_v51 = vld [vmem:[%s2442_s0 + $0x1c8] sm:$0xff]  ;;  %v1343_v52 = vld [vmem:[%s2442_s0 + $0x358] sm:$0xff]  ;;  %v1392_v53 = vld [vmem:[%s2442_s0 + $0x4e0] sm:$0xff] }
  0x13   :  { %91 = vmatpush.msra.mxu0 %v21_v8  ;;  %354 = vmatpush.msra.mxu1 %v21_v8  ;;  %v40_v54 = vld [vmem:[%s2442_s0 + $0x48] sm:$0xff]  ;;  %v1294_v55 = vld [vmem:[%s2442_s0 + $0x1d0] sm:$0xff]  ;;  %v1344_v56 = vld [vmem:[%s2442_s0 + $0x360] sm:$0xff] }
  0x14   :  { %667 = vmatpush.msra.mxu2 %v20_v9  ;;  %930 = vmatpush.msra.mxu3 %v20_v9  ;;  %v1393_v57 = vld [vmem:[%s2442_s0 + $0x4e8] sm:$0xff]  ;;  %v41_v58 = vld [vmem:[%s2442_s0 + $0x50] sm:$0xff]  ;;  %v1295_v59 = vld [vmem:[%s2442_s0 + $0x1d8] sm:$0xff] }
  0x15   :  { %92 = vmatpush.msra.mxu0 %v20_v9  ;;  %355 = vmatpush.msra.mxu1 %v20_v9  ;;  %v1345_v60 = vld [vmem:[%s2442_s0 + $0x368] sm:$0xff]  ;;  %v1394_v61 = vld [vmem:[%s2442_s0 + $0x4f0] sm:$0xff]  ;;  %v42_v62 = vld [vmem:[%s2442_s0 + $0x58] sm:$0xff] }
  0x16   :  { %668 = vmatpush.msra.mxu2 %v19_v10  ;;  %931 = vmatpush.msra.mxu3 %v19_v10  ;;  %v1296_v63 = vld [vmem:[%s2442_s0 + $0x1e0] sm:$0xff]  ;;  %v1346_v0 = vld [vmem:[%s2442_s0 + $0x370] sm:$0xff]  ;;  %v1395_v1 = vld [vmem:[%s2442_s0 + $0x4f8] sm:$0xff] }
  0x17   :  { %93 = vmatpush.msra.mxu0 %v19_v10  ;;  %356 = vmatpush.msra.mxu1 %v19_v10  ;;  %v43_v2 = vld [vmem:[%s2442_s0 + $0x60] sm:$0xff]  ;;  %v1297_v3 = vld [vmem:[%s2442_s0 + $0x1e8] sm:$0xff]  ;;  %v1347_v4 = vld [vmem:[%s2442_s0 + $0x378] sm:$0xff] }
  0x18   :  { %669 = vmatpush.msra.mxu2 %v18_v11  ;;  %932 = vmatpush.msra.mxu3 %v18_v11  ;;  %v1396_v5 = vld [vmem:[%s2442_s0 + $0x500] sm:$0xff]  ;;  %v44_v6 = vld [vmem:[%s2442_s0 + $0x68] sm:$0xff]  ;;  %v1298_v7 = vld [vmem:[%s2442_s0 + $0x1f0] sm:$0xff] }
  0x19   :  { %94 = vmatpush.msra.mxu0 %v18_v11  ;;  %357 = vmatpush.msra.mxu1 %v18_v11  ;;  %v1348_v8 = vld [vmem:[%s2442_s0 + $0x380] sm:$0xff]  ;;  %v1397_v9 = vld [vmem:[%s2442_s0 + $0x508] sm:$0xff]  ;;  %v45_v10 = vld [vmem:[%s2442_s0 + $0x70] sm:$0xff] }
  0x1a   :  { %670 = vmatpush.msra.mxu2 %v17_v12  ;;  %933 = vmatpush.msra.mxu3 %v17_v12  ;;  %v1299_v11 = vld [vmem:[%s2442_s0 + $0x1f8] sm:$0xff] }
  0x1b   :  { %95 = vmatpush.msra.mxu0 %v17_v12  ;;  %358 = vmatpush.msra.mxu1 %v17_v12  ;;  %v1349_v12 = vld [vmem:[%s2442_s0 + $0x388] sm:$0xff] }
  0x1c   :  { %671 = vmatpush.msra.mxu2 %v16_v13  ;;  %934 = vmatpush.msra.mxu3 %v16_v13 }
  0x1d   :  { %96 = vmatpush.msra.mxu0 %v16_v13  ;;  %359 = vmatpush.msra.mxu1 %v16_v13  ;;  %v1398_v13 = vld [vmem:[%s2442_s0 + $0x510] sm:$0xff] }
  0x1e   :  { %672 = vmatpush.msra.mxu2 %v15_v14  ;;  %935 = vmatpush.msra.mxu3 %v15_v14 }
  0x1f   :  { %97 = vmatpush.msra.mxu0 %v15_v14  ;;  %360 = vmatpush.msra.mxu1 %v15_v14  ;;  %v46_v14 = vld [vmem:[%s2442_s0 + $0x78] sm:$0xff] }
  0x20   :  { %673 = vmatpush.msra.mxu2 %v14_v15  ;;  %936 = vmatpush.msra.mxu3 %v14_v15 }
  0x21   :  { %674 = vmatmul.f32.vlgmr.msra.gmra.mxu2 %v1334_v16  ;;  %937 = vmatmul.f32.vlgmr.msra.gmra.mxu3 %v1383_v17  ;;  %v1698_v16 = vld [vmem:[%s2443_s2] ss:$0 sm:$0xff]  ;;  %v1350_v17 = vld [vmem:[%s2442_s0 + $0x390] sm:$0xff] }
  0x22   :  { %98 = vmatpush.msra.mxu0 %v14_v15  ;;  %361 = vmatpush.msra.mxu1 %v14_v15  ;;  %v1300_v15 = vld [vmem:[%s2442_s0 + $0x200] sm:$0xff] }
  0x23   :  { %99 = vmatmul.f32.vlgmr.msra.gmra.mxu0 %v31_v18  ;;  %362 = vmatmul.f32.vlgmr.msra.gmra.mxu1 %v1285_v19  ;;  %v1399_v18 = vld [vmem:[%s2442_s0 + $0x518] sm:$0xff] }
  0x29   :  { %677 = vmatmul.f32.gmra.mxu2 %v1335_v20  ;;  %940 = vmatmul.f32.gmra.mxu3 %v1384_v21  ;;  %v47_v21 = vld [vmem:[%s2442_s0 + $0x80] sm:$0xff] }
  0x2b   :  { %102 = vmatmul.f32.gmra.mxu0 %v32_v22  ;;  %365 = vmatmul.f32.gmra.mxu1 %v1286_v23  ;;  %v1301_v22 = vld [vmem:[%s2442_s0 + $0x208] sm:$0xff] }
  0x31   :  { %680 = vmatmul.f32.gmra.mxu2 %v1336_v24  ;;  %943 = vmatmul.f32.gmra.mxu3 %v1385_v25 }
  0x33   :  { %105 = vmatmul.f32.gmra.mxu0 %v33_v26  ;;  %368 = vmatmul.f32.gmra.mxu1 %v1287_v27 }
  0x39   :  { %683 = vmatmul.f32.gmra.mxu2 %v1337_v28  ;;  %946 = vmatmul.f32.gmra.mxu3 %v1386_v29 }
  0x3b   :  { %108 = vmatmul.f32.gmra.mxu0 %v34_v30  ;;  %371 = vmatmul.f32.gmra.mxu1 %v1288_v31  ;;  %v1351_v31 = vld [vmem:[%s2442_s0 + $0x398] sm:$0xff] }
  0x41   :  { %686 = vmatmul.f32.gmra.mxu2 %v1338_v32  ;;  %949 = vmatmul.f32.gmra.mxu3 %v1387_v33  ;;  %v1400_v32 = vld [vmem:[%s2442_s0 + $0x520] sm:$0xff] }
  0x43   :  { %111 = vmatmul.f32.gmra.mxu0 %v35_v34  ;;  %374 = vmatmul.f32.gmra.mxu1 %v1289_v35 }
  0x49   :  { %689 = vmatmul.f32.gmra.mxu2 %v1339_v36  ;;  %952 = vmatmul.f32.gmra.mxu3 %v1388_v37 }
  0x4b   :  { %114 = vmatmul.f32.gmra.mxu0 %v36_v38  ;;  %377 = vmatmul.f32.gmra.mxu1 %v1290_v39  ;;  %v48_v38 = vld [vmem:[%s2442_s0 + $0x88] sm:$0xff]  ;;  %v1302_v39 = vld [vmem:[%s2442_s0 + $0x210] sm:$0xff] }
  0x51   :  { %692 = vmatmul.f32.gmra.mxu2 %v1340_v40  ;;  %955 = vmatmul.f32.gmra.mxu3 %v1389_v41 }
  0x53   :  { %117 = vmatmul.f32.gmra.mxu0 %v37_v42  ;;  %380 = vmatmul.f32.gmra.mxu1 %v1291_v43 }
  0x59   :  { %695 = vmatmul.f32.gmra.mxu2 %v1341_v44  ;;  %958 = vmatmul.f32.gmra.mxu3 %v1390_v45 }
  0x5b   :  { %120 = vmatmul.f32.gmra.mxu0 %v38_v46  ;;  %383 = vmatmul.f32.gmra.mxu1 %v1292_v47 }
  0x61   :  { %698 = vmatmul.f32.gmra.mxu2 %v1342_v48  ;;  %961 = vmatmul.f32.gmra.mxu3 %v1391_v49 }
  0x63   :  { %123 = vmatmul.f32.gmra.mxu0 %v39_v50  ;;  %386 = vmatmul.f32.gmra.mxu1 %v1293_v51  ;;  %v1352_v50 = vld [vmem:[%s2442_s0 + $0x3a0] sm:$0xff]  ;;  %v1401_v51 = vld [vmem:[%s2442_s0 + $0x528] sm:$0xff] }
  0x69   :  { %701 = vmatmul.f32.gmra.mxu2 %v1343_v52  ;;  %964 = vmatmul.f32.gmra.mxu3 %v1392_v53 }
  0x6b   :  { %126 = vmatmul.f32.gmra.mxu0 %v40_v54  ;;  %389 = vmatmul.f32.gmra.mxu1 %v1294_v55 }
  0x71   :  { %704 = vmatmul.f32.gmra.mxu2 %v1344_v56  ;;  %967 = vmatmul.f32.gmra.mxu3 %v1393_v57  ;;  %v49_v57 = vld [vmem:[%s2442_s0 + $0x90] sm:$0xff] }
  0x73   :  { %129 = vmatmul.f32.gmra.mxu0 %v41_v58  ;;  %392 = vmatmul.f32.gmra.mxu1 %v1295_v59  ;;  %v1303_v58 = vld [vmem:[%s2442_s0 + $0x218] sm:$0xff] }
  0x79   :  { %707 = vmatmul.f32.gmra.mxu2 %v1345_v60  ;;  %970 = vmatmul.f32.gmra.mxu3 %v1394_v61 }
  0x7b   :  { %132 = vmatmul.f32.gmra.mxu0 %v42_v62  ;;  %395 = vmatmul.f32.gmra.mxu1 %v1296_v63 }
  0x81   :  { %710 = vmatmul.f32.gmra.mxu2 %v1346_v0  ;;  %973 = vmatmul.f32.gmra.mxu3 %v1395_v1 }
  0x83   :  { %135 = vmatmul.f32.gmra.mxu0 %v43_v2  ;;  %398 = vmatmul.f32.gmra.mxu1 %v1297_v3 }
  0x89   :  { %713 = vmatmul.f32.gmra.mxu2 %v1347_v4  ;;  %976 = vmatmul.f32.gmra.mxu3 %v1396_v5  ;;  %v1353_v5 = vld [vmem:[%s2442_s0 + $0x3a8] sm:$0xff] }
  0x8b   :  { %138 = vmatmul.f32.gmra.mxu0 %v44_v6  ;;  %401 = vmatmul.f32.gmra.mxu1 %v1298_v7  ;;  %v1402_v6 = vld [vmem:[%s2442_s0 + $0x530] sm:$0xff] }
  0x91   :  { %716 = vmatmul.f32.gmra.mxu2 %v1348_v8  ;;  %979 = vmatmul.f32.gmra.mxu3 %v1397_v9 }
  0x93   :  { %141 = vmatmul.f32.gmra.mxu0 %v45_v10  ;;  %404 = vmatmul.f32.gmra.mxu1 %v1299_v11 }
  0x99   :  { %719 = vmatmul.f32.gmra.mxu2 %v1349_v12  ;;  %982 = vmatmul.f32.gmra.mxu3 %v1398_v13  ;;  %v50_v12 = vld [vmem:[%s2442_s0 + $0x98] sm:$0xff]  ;;  %v1304_v13 = vld [vmem:[%s2442_s0 + $0x220] sm:$0xff] }
  0x9b   :  { %144 = vmatmul.f32.gmra.mxu0 %v46_v14  ;;  %407 = vmatmul.f32.gmra.mxu1 %v1300_v15 }
  0xa0   :  { %v100_v19 = vpop.f32.mrf.mxu0  ;;  %v363_v20 = vpop.f32.mrf.mxu1 }
  0xa1   :  { %722 = vmatmul.f32.gmra.mxu2 %v1350_v17  ;;  %985 = vmatmul.f32.gmra.mxu3 %v1399_v18  ;;  %v101_v23 = vadd.f32 %v1698_v16, %v100_v19  ;;  %v364_v24 = vadd.f32 %v1698_v16, %v363_v20 }
  0xa3   :  { %v247_v25 = vmax.f32 %v101_v23, 0.0  ;;  %v510_v26 = vmax.f32 %v364_v24, 0.0  ;;  %147 = vmatmul.f32.gmra.mxu0 %v47_v21  ;;  %410 = vmatmul.f32.gmra.mxu1 %v1301_v22 }
  0xa4   :  { %v675_v27 = vpop.f32.mrf.mxu2  ;;  %v938_v28 = vpop.f32.mrf.mxu3 }
  0xa5   :  { %v676_v29 = vadd.f32 %v1698_v16, %v675_v27  ;;  %v939_v30 = vadd.f32 %v1698_v16, %v938_v28  ;;  %v559_v33 = vmax.f32 %v247_v25, %v510_v26  ;;  %v1354_v25 = vld [vmem:[%s2442_s0 + $0x3b0] sm:$0xff]  ;;  %v1403_v26 = vld [vmem:[%s2442_s0 + $0x538] sm:$0xff] }
  0xa7   :  { %v822_v34 = vmax.f32 %v676_v29, 0.0  ;;  %v1085_v35 = vmax.f32 %v939_v30, 0.0 }
  0xa8   :  { %v103_v36 = vpop.f32.mrf.mxu0  ;;  %v366_v37 = vpop.f32.mrf.mxu1 }
  0xa9   :  { %v1134_v40 = vmax.f32 %v822_v34, %v1085_v35  ;;  %725 = vmatmul.f32.gmra.mxu2 %v1351_v31  ;;  %988 = vmatmul.f32.gmra.mxu3 %v1400_v32  ;;  %v104_v41 = vadd.f32 %v1698_v16, %v103_v36  ;;  %v367_v42 = vadd.f32 %v1698_v16, %v366_v37  ;;  %v51_v32 = vld [vmem:[%s2442_s0 + $0xa0] sm:$0xff] }
  0xab   :  { %v1183_v43 = vmax.f32 %v559_v33, %v1134_v40  ;;  %v248_v44 = vmax.f32 %v104_v41, 0.0  ;;  %v511_v45 = vmax.f32 %v367_v42, 0.0  ;;  %150 = vmatmul.f32.gmra.mxu0 %v48_v38  ;;  %413 = vmatmul.f32.gmra.mxu1 %v1302_v39  ;;  %v1305_v33 = vld [vmem:[%s2442_s0 + $0x228] sm:$0xff] }
  0xac   :  { %v678_v46 = vpop.f32.mrf.mxu2  ;;  %v941_v47 = vpop.f32.mrf.mxu3 }
  0xad   :  { %1232 = vst [vmem:[%s2444_s3] sm:$0xff] %v1183_v43  ;;  %v679_v48 = vadd.f32 %v1698_v16, %v678_v46  ;;  %v942_v49 = vadd.f32 %v1698_v16, %v941_v47  ;;  %v560_v52 = vmax.f32 %v248_v44, %v511_v45  ;;  %v1355_v44 = vld [vmem:[%s2442_s0 + $0x3b8] sm:$0xff]  ;;  %v1404_v45 = vld [vmem:[%s2442_s0 + $0x540] sm:$0xff] }
  0xaf   :  { %v823_v53 = vmax.f32 %v679_v48, 0.0  ;;  %v1086_v54 = vmax.f32 %v942_v49, 0.0 }
  0xb0   :  { %v106_v55 = vpop.f32.mrf.mxu0  ;;  %v369_v56 = vpop.f32.mrf.mxu1 }
  0xb1   :  { %v1135_v59 = vmax.f32 %v823_v53, %v1086_v54  ;;  %728 = vmatmul.f32.gmra.mxu2 %v1352_v50  ;;  %991 = vmatmul.f32.gmra.mxu3 %v1401_v51  ;;  %v107_v60 = vadd.f32 %v1698_v16, %v106_v55  ;;  %v370_v61 = vadd.f32 %v1698_v16, %v369_v56  ;;  %v52_v51 = vld [vmem:[%s2442_s0 + $0xa8] sm:$0xff] }
  0xb3   :  { %v1184_v62 = vmax.f32 %v560_v52, %v1135_v59  ;;  %v249_v63 = vmax.f32 %v107_v60, 0.0  ;;  %v512_v0 = vmax.f32 %v370_v61, 0.0  ;;  %153 = vmatmul.f32.gmra.mxu0 %v49_v57  ;;  %416 = vmatmul.f32.gmra.mxu1 %v1303_v58  ;;  %v1306_v52 = vld [vmem:[%s2442_s0 + $0x230] sm:$0xff] }
  0xb4   :  { %v681_v1 = vpop.f32.mrf.mxu2  ;;  %v944_v2 = vpop.f32.mrf.mxu3 }
  0xb5   :  { %1233 = vst [vmem:[%s2444_s3 + $0x8] sm:$0xff] %v1184_v62  ;;  %v682_v3 = vadd.f32 %v1698_v16, %v681_v1  ;;  %v945_v4 = vadd.f32 %v1698_v16, %v944_v2  ;;  %v561_v7 = vmax.f32 %v249_v63, %v512_v0  ;;  %v1356_v63 = vld [vmem:[%s2442_s0 + $0x3c0] sm:$0xff]  ;;  %v1405_v0 = vld [vmem:[%s2442_s0 + $0x548] sm:$0xff] }
  0xb7   :  { %v824_v8 = vmax.f32 %v682_v3, 0.0  ;;  %v1087_v9 = vmax.f32 %v945_v4, 0.0 }
  0xb8   :  { %v109_v10 = vpop.f32.mrf.mxu0  ;;  %v372_v11 = vpop.f32.mrf.mxu1 }
  0xb9   :  { %v1136_v14 = vmax.f32 %v824_v8, %v1087_v9  ;;  %731 = vmatmul.f32.gmra.mxu2 %v1353_v5  ;;  %994 = vmatmul.f32.gmra.mxu3 %v1402_v6  ;;  %v110_v15 = vadd.f32 %v1698_v16, %v109_v10  ;;  %v373_v17 = vadd.f32 %v1698_v16, %v372_v11  ;;  %v53_v6 = vld [vmem:[%s2442_s0 + $0xb0] sm:$0xff] }
  0xbb   :  { %v1185_v18 = vmax.f32 %v561_v7, %v1136_v14  ;;  %v250_v19 = vmax.f32 %v110_v15, 0.0  ;;  %v513_v20 = vmax.f32 %v373_v17, 0.0  ;;  %156 = vmatmul.f32.gmra.mxu0 %v50_v12  ;;  %419 = vmatmul.f32.gmra.mxu1 %v1304_v13  ;;  %v1307_v7 = vld [vmem:[%s2442_s0 + $0x238] sm:$0xff] }
  0xbc   :  { %v684_v21 = vpop.f32.mrf.mxu2  ;;  %v947_v22 = vpop.f32.mrf.mxu3 }
  0xbd   :  { %1234 = vst [vmem:[%s2444_s3 + $0x10] sm:$0xff] %v1185_v18  ;;  %v685_v23 = vadd.f32 %v1698_v16, %v684_v21  ;;  %v948_v24 = vadd.f32 %v1698_v16, %v947_v22  ;;  %v562_v27 = vmax.f32 %v250_v19, %v513_v20  ;;  %v1357_v19 = vld [vmem:[%s2442_s0 + $0x3c8] sm:$0xff]  ;;  %v1406_v20 = vld [vmem:[%s2442_s0 + $0x550] sm:$0xff] }
  0xbf   :  { %v825_v28 = vmax.f32 %v685_v23, 0.0  ;;  %v1088_v29 = vmax.f32 %v948_v24, 0.0 }
  0xc0   :  { %v112_v30 = vpop.f32.mrf.mxu0  ;;  %v375_v31 = vpop.f32.mrf.mxu1 }
  0xc1   :  { %v1137_v34 = vmax.f32 %v825_v28, %v1088_v29  ;;  %734 = vmatmul.f32.gmra.mxu2 %v1354_v25  ;;  %997 = vmatmul.f32.gmra.mxu3 %v1403_v26  ;;  %v113_v35 = vadd.f32 %v1698_v16, %v112_v30  ;;  %v376_v36 = vadd.f32 %v1698_v16, %v375_v31  ;;  %v54_v26 = vld [vmem:[%s2442_s0 + $0xb8] sm:$0xff] }
  0xc3   :  { %v1186_v37 = vmax.f32 %v562_v27, %v1137_v34  ;;  %v251_v38 = vmax.f32 %v113_v35, 0.0  ;;  %v514_v39 = vmax.f32 %v376_v36, 0.0  ;;  %159 = vmatmul.f32.gmra.mxu0 %v51_v32  ;;  %422 = vmatmul.f32.gmra.mxu1 %v1305_v33  ;;  %v1308_v27 = vld [vmem:[%s2442_s0 + $0x240] sm:$0xff] }
  0xc4   :  { %v687_v40 = vpop.f32.mrf.mxu2  ;;  %v950_v41 = vpop.f32.mrf.mxu3 }
  0xc5   :  { %1235 = vst [vmem:[%s2444_s3 + $0x18] sm:$0xff] %v1186_v37  ;;  %v688_v42 = vadd.f32 %v1698_v16, %v687_v40  ;;  %v951_v43 = vadd.f32 %v1698_v16, %v950_v41  ;;  %v563_v46 = vmax.f32 %v251_v38, %v514_v39  ;;  %v1358_v38 = vld [vmem:[%s2442_s0 + $0x3d0] sm:$0xff]  ;;  %v1407_v39 = vld [vmem:[%s2442_s0 + $0x558] sm:$0xff] }
  0xc7   :  { %v826_v47 = vmax.f32 %v688_v42, 0.0  ;;  %v1089_v48 = vmax.f32 %v951_v43, 0.0 }
  0xc8   :  { %v115_v49 = vpop.f32.mrf.mxu0  ;;  %v378_v50 = vpop.f32.mrf.mxu1 }
  0xc9   :  { %v1138_v53 = vmax.f32 %v826_v47, %v1089_v48  ;;  %737 = vmatmul.f32.gmra.mxu2 %v1355_v44  ;;  %1000 = vmatmul.f32.gmra.mxu3 %v1404_v45  ;;  %v116_v54 = vadd.f32 %v1698_v16, %v115_v49  ;;  %v379_v55 = vadd.f32 %v1698_v16, %v378_v50  ;;  %v55_v45 = vld [vmem:[%s2442_s0 + $0xc0] sm:$0xff] }
  0xcb   :  { %v1187_v56 = vmax.f32 %v563_v46, %v1138_v53  ;;  %v252_v57 = vmax.f32 %v116_v54, 0.0  ;;  %v515_v58 = vmax.f32 %v379_v55, 0.0  ;;  %162 = vmatmul.f32.gmra.mxu0 %v52_v51  ;;  %425 = vmatmul.f32.gmra.mxu1 %v1306_v52  ;;  %v1309_v46 = vld [vmem:[%s2442_s0 + $0x248] sm:$0xff] }
  0xcc   :  { %v690_v59 = vpop.f32.mrf.mxu2  ;;  %v953_v60 = vpop.f32.mrf.mxu3 }
  0xcd   :  { %1236 = vst [vmem:[%s2444_s3 + $0x20] sm:$0xff] %v1187_v56  ;;  %v691_v61 = vadd.f32 %v1698_v16, %v690_v59  ;;  %v954_v62 = vadd.f32 %v1698_v16, %v953_v60  ;;  %v564_v1 = vmax.f32 %v252_v57, %v515_v58  ;;  %v1359_v57 = vld [vmem:[%s2442_s0 + $0x3d8] sm:$0xff]  ;;  %v1408_v58 = vld [vmem:[%s2442_s0 + $0x560] sm:$0xff] }
  0xcf   :  { %v827_v2 = vmax.f32 %v691_v61, 0.0  ;;  %v1090_v3 = vmax.f32 %v954_v62, 0.0 }
  0xd0   :  { %v118_v4 = vpop.f32.mrf.mxu0  ;;  %v381_v5 = vpop.f32.mrf.mxu1 }
  0xd1   :  { %v1139_v8 = vmax.f32 %v827_v2, %v1090_v3  ;;  %740 = vmatmul.f32.gmra.mxu2 %v1356_v63  ;;  %1003 = vmatmul.f32.gmra.mxu3 %v1405_v0  ;;  %v119_v9 = vadd.f32 %v1698_v16, %v118_v4  ;;  %v382_v10 = vadd.f32 %v1698_v16, %v381_v5  ;;  %v56_v0 = vld [vmem:[%s2442_s0 + $0xc8] sm:$0xff] }
  0xd3   :  { %v1188_v11 = vmax.f32 %v564_v1, %v1139_v8  ;;  %v253_v12 = vmax.f32 %v119_v9, 0.0  ;;  %v516_v13 = vmax.f32 %v382_v10, 0.0  ;;  %165 = vmatmul.f32.gmra.mxu0 %v53_v6  ;;  %428 = vmatmul.f32.gmra.mxu1 %v1307_v7  ;;  %v1310_v1 = vld [vmem:[%s2442_s0 + $0x250] sm:$0xff] }
  0xd4   :  { %v693_v14 = vpop.f32.mrf.mxu2  ;;  %v956_v15 = vpop.f32.mrf.mxu3 }
  0xd5   :  { %1237 = vst [vmem:[%s2444_s3 + $0x28] sm:$0xff] %v1188_v11  ;;  %v694_v17 = vadd.f32 %v1698_v16, %v693_v14  ;;  %v957_v18 = vadd.f32 %v1698_v16, %v956_v15  ;;  %v565_v21 = vmax.f32 %v253_v12, %v516_v13  ;;  %v1360_v12 = vld [vmem:[%s2442_s0 + $0x3e0] sm:$0xff]  ;;  %v1409_v13 = vld [vmem:[%s2442_s0 + $0x568] sm:$0xff] }
  0xd7   :  { %v828_v22 = vmax.f32 %v694_v17, 0.0  ;;  %v1091_v23 = vmax.f32 %v957_v18, 0.0 }
  0xd8   :  { %v121_v24 = vpop.f32.mrf.mxu0  ;;  %v384_v25 = vpop.f32.mrf.mxu1 }
  0xd9   :  { %v1140_v28 = vmax.f32 %v828_v22, %v1091_v23  ;;  %743 = vmatmul.f32.gmra.mxu2 %v1357_v19  ;;  %1006 = vmatmul.f32.gmra.mxu3 %v1406_v20  ;;  %v122_v29 = vadd.f32 %v1698_v16, %v121_v24  ;;  %v385_v30 = vadd.f32 %v1698_v16, %v384_v25  ;;  %v57_v20 = vld [vmem:[%s2442_s0 + $0xd0] sm:$0xff] }
  0xdb   :  { %v1189_v31 = vmax.f32 %v565_v21, %v1140_v28  ;;  %v254_v32 = vmax.f32 %v122_v29, 0.0  ;;  %v517_v33 = vmax.f32 %v385_v30, 0.0  ;;  %168 = vmatmul.f32.gmra.mxu0 %v54_v26  ;;  %431 = vmatmul.f32.gmra.mxu1 %v1308_v27  ;;  %v1311_v21 = vld [vmem:[%s2442_s0 + $0x258] sm:$0xff] }
  0xdc   :  { %v696_v34 = vpop.f32.mrf.mxu2  ;;  %v959_v35 = vpop.f32.mrf.mxu3 }
  0xdd   :  { %1238 = vst [vmem:[%s2444_s3 + $0x30] sm:$0xff] %v1189_v31  ;;  %v697_v36 = vadd.f32 %v1698_v16, %v696_v34  ;;  %v960_v37 = vadd.f32 %v1698_v16, %v959_v35  ;;  %v566_v40 = vmax.f32 %v254_v32, %v517_v33  ;;  %v1361_v32 = vld [vmem:[%s2442_s0 + $0x3e8] sm:$0xff]  ;;  %v1410_v33 = vld [vmem:[%s2442_s0 + $0x570] sm:$0xff] }
  0xdf   :  { %v829_v41 = vmax.f32 %v697_v36, 0.0  ;;  %v1092_v42 = vmax.f32 %v960_v37, 0.0 }
  0xe0   :  { %v124_v43 = vpop.f32.mrf.mxu0  ;;  %v387_v44 = vpop.f32.mrf.mxu1 }
  0xe1   :  { %v1141_v47 = vmax.f32 %v829_v41, %v1092_v42  ;;  %746 = vmatmul.f32.gmra.mxu2 %v1358_v38  ;;  %1009 = vmatmul.f32.gmra.mxu3 %v1407_v39  ;;  %v125_v48 = vadd.f32 %v1698_v16, %v124_v43  ;;  %v388_v49 = vadd.f32 %v1698_v16, %v387_v44  ;;  %v58_v39 = vld [vmem:[%s2442_s0 + $0xd8] sm:$0xff] }
  0xe3   :  { %v1190_v50 = vmax.f32 %v566_v40, %v1141_v47  ;;  %v255_v51 = vmax.f32 %v125_v48, 0.0  ;;  %v518_v52 = vmax.f32 %v388_v49, 0.0  ;;  %171 = vmatmul.f32.gmra.mxu0 %v55_v45  ;;  %434 = vmatmul.f32.gmra.mxu1 %v1309_v46  ;;  %v1312_v40 = vld [vmem:[%s2442_s0 + $0x260] sm:$0xff] }
  0xe4   :  { %v699_v53 = vpop.f32.mrf.mxu2  ;;  %v962_v54 = vpop.f32.mrf.mxu3 }
  0xe5   :  { %1239 = vst [vmem:[%s2444_s3 + $0x38] sm:$0xff] %v1190_v50  ;;  %v700_v55 = vadd.f32 %v1698_v16, %v699_v53  ;;  %v963_v56 = vadd.f32 %v1698_v16, %v962_v54  ;;  %v567_v59 = vmax.f32 %v255_v51, %v518_v52  ;;  %v1362_v51 = vld [vmem:[%s2442_s0 + $0x3f0] sm:$0xff]  ;;  %v1411_v52 = vld [vmem:[%s2442_s0 + $0x578] sm:$0xff] }
  0xe7   :  { %v830_v60 = vmax.f32 %v700_v55, 0.0  ;;  %v1093_v61 = vmax.f32 %v963_v56, 0.0 }
  0xe8   :  { %v127_v62 = vpop.f32.mrf.mxu0  ;;  %v390_v63 = vpop.f32.mrf.mxu1 }
  0xe9   :  { %v1142_v2 = vmax.f32 %v830_v60, %v1093_v61  ;;  %749 = vmatmul.f32.gmra.mxu2 %v1359_v57  ;;  %1012 = vmatmul.f32.gmra.mxu3 %v1408_v58  ;;  %v128_v3 = vadd.f32 %v1698_v16, %v127_v62  ;;  %v391_v4 = vadd.f32 %v1698_v16, %v390_v63  ;;  %v59_v58 = vld [vmem:[%s2442_s0 + $0xe0] sm:$0xff] }
  0xeb   :  { %v1191_v5 = vmax.f32 %v567_v59, %v1142_v2  ;;  %v256_v6 = vmax.f32 %v128_v3, 0.0  ;;  %v519_v7 = vmax.f32 %v391_v4, 0.0  ;;  %174 = vmatmul.f32.gmra.mxu0 %v56_v0  ;;  %437 = vmatmul.f32.gmra.mxu1 %v1310_v1  ;;  %v1313_v59 = vld [vmem:[%s2442_s0 + $0x268] sm:$0xff] }
  0xec   :  { %v702_v8 = vpop.f32.mrf.mxu2  ;;  %v965_v9 = vpop.f32.mrf.mxu3 }
  0xed   :  { %1240 = vst [vmem:[%s2444_s3 + $0x40] sm:$0xff] %v1191_v5  ;;  %v703_v10 = vadd.f32 %v1698_v16, %v702_v8  ;;  %v966_v11 = vadd.f32 %v1698_v16, %v965_v9  ;;  %v568_v14 = vmax.f32 %v256_v6, %v519_v7  ;;  %v1363_v6 = vld [vmem:[%s2442_s0 + $0x3f8] sm:$0xff]  ;;  %v1412_v7 = vld [vmem:[%s2442_s0 + $0x580] sm:$0xff] }
  0xef   :  { %v831_v15 = vmax.f32 %v703_v10, 0.0  ;;  %v1094_v17 = vmax.f32 %v966_v11, 0.0 }
  0xf0   :  { %v130_v18 = vpop.f32.mrf.mxu0  ;;  %v393_v19 = vpop.f32.mrf.mxu1 }
  0xf1   :  { %v1143_v22 = vmax.f32 %v831_v15, %v1094_v17  ;;  %752 = vmatmul.f32.gmra.mxu2 %v1360_v12  ;;  %1015 = vmatmul.f32.gmra.mxu3 %v1409_v13  ;;  %v131_v23 = vadd.f32 %v1698_v16, %v130_v18  ;;  %v394_v24 = vadd.f32 %v1698_v16, %v393_v19  ;;  %v60_v13 = vld [vmem:[%s2442_s0 + $0xe8] sm:$0xff] }
  0xf3   :  { %v1192_v25 = vmax.f32 %v568_v14, %v1143_v22  ;;  %v257_v26 = vmax.f32 %v131_v23, 0.0  ;;  %v520_v27 = vmax.f32 %v394_v24, 0.0  ;;  %177 = vmatmul.f32.gmra.mxu0 %v57_v20  ;;  %440 = vmatmul.f32.gmra.mxu1 %v1311_v21  ;;  %v1314_v14 = vld [vmem:[%s2442_s0 + $0x270] sm:$0xff] }
  0xf4   :  { %v705_v28 = vpop.f32.mrf.mxu2  ;;  %v968_v29 = vpop.f32.mrf.mxu3 }
  0xf5   :  { %1241 = vst [vmem:[%s2444_s3 + $0x48] sm:$0xff] %v1192_v25  ;;  %v706_v30 = vadd.f32 %v1698_v16, %v705_v28  ;;  %v969_v31 = vadd.f32 %v1698_v16, %v968_v29  ;;  %v569_v34 = vmax.f32 %v257_v26, %v520_v27  ;;  %v1364_v26 = vld [vmem:[%s2442_s0 + $0x400] sm:$0xff]  ;;  %v1413_v27 = vld [vmem:[%s2442_s0 + $0x588] sm:$0xff] }
  0xf7   :  { %v832_v35 = vmax.f32 %v706_v30, 0.0  ;;  %v1095_v36 = vmax.f32 %v969_v31, 0.0 }
  0xf8   :  { %v133_v37 = vpop.f32.mrf.mxu0  ;;  %v396_v38 = vpop.f32.mrf.mxu1 }
  0xf9   :  { %v1144_v41 = vmax.f32 %v832_v35, %v1095_v36  ;;  %755 = vmatmul.f32.gmra.mxu2 %v1361_v32  ;;  %1018 = vmatmul.f32.gmra.mxu3 %v1410_v33  ;;  %v134_v42 = vadd.f32 %v1698_v16, %v133_v37  ;;  %v397_v43 = vadd.f32 %v1698_v16, %v396_v38  ;;  %v61_v33 = vld [vmem:[%s2442_s0 + $0xf0] sm:$0xff] }
  0xfb   :  { %v1193_v44 = vmax.f32 %v569_v34, %v1144_v41  ;;  %v258_v45 = vmax.f32 %v134_v42, 0.0  ;;  %v521_v46 = vmax.f32 %v397_v43, 0.0  ;;  %180 = vmatmul.f32.gmra.mxu0 %v58_v39  ;;  %443 = vmatmul.f32.gmra.mxu1 %v1312_v40  ;;  %v1315_v34 = vld [vmem:[%s2442_s0 + $0x278] sm:$0xff] }
  0xfc   :  { %v708_v47 = vpop.f32.mrf.mxu2  ;;  %v971_v48 = vpop.f32.mrf.mxu3 }
  0xfd   :  { %1242 = vst [vmem:[%s2444_s3 + $0x50] sm:$0xff] %v1193_v44  ;;  %v709_v49 = vadd.f32 %v1698_v16, %v708_v47  ;;  %v972_v50 = vadd.f32 %v1698_v16, %v971_v48  ;;  %v570_v53 = vmax.f32 %v258_v45, %v521_v46  ;;  %v1365_v45 = vld [vmem:[%s2442_s0 + $0x408] sm:$0xff]  ;;  %v1414_v46 = vld [vmem:[%s2442_s0 + $0x590] sm:$0xff] }
  0xff   :  { %v833_v54 = vmax.f32 %v709_v49, 0.0  ;;  %v1096_v55 = vmax.f32 %v972_v50, 0.0 }
 0x100   :  { %v136_v56 = vpop.f32.mrf.mxu0  ;;  %v399_v57 = vpop.f32.mrf.mxu1 }
 0x101   :  { %v1145_v60 = vmax.f32 %v833_v54, %v1096_v55  ;;  %758 = vmatmul.f32.gmra.mxu2 %v1362_v51  ;;  %1021 = vmatmul.f32.gmra.mxu3 %v1411_v52  ;;  %v137_v61 = vadd.f32 %v1698_v16, %v136_v56  ;;  %v400_v62 = vadd.f32 %v1698_v16, %v399_v57  ;;  %v62_v52 = vld [vmem:[%s2442_s0 + $0xf8] sm:$0xff] }
 0x103   :  { %v1194_v63 = vmax.f32 %v570_v53, %v1145_v60  ;;  %v259_v0 = vmax.f32 %v137_v61, 0.0  ;;  %v522_v1 = vmax.f32 %v400_v62, 0.0  ;;  %183 = vmatmul.f32.gmra.mxu0 %v59_v58  ;;  %446 = vmatmul.f32.gmra.mxu1 %v1313_v59  ;;  %v1316_v53 = vld [vmem:[%s2442_s0 + $0x280] sm:$0xff] }
 0x104   :  { %v711_v2 = vpop.f32.mrf.mxu2  ;;  %v974_v3 = vpop.f32.mrf.mxu3 }
 0x105   :  { %1243 = vst [vmem:[%s2444_s3 + $0x58] sm:$0xff] %v1194_v63  ;;  %v712_v4 = vadd.f32 %v1698_v16, %v711_v2  ;;  %v975_v5 = vadd.f32 %v1698_v16, %v974_v3  ;;  %v571_v8 = vmax.f32 %v259_v0, %v522_v1  ;;  %v1366_v0 = vld [vmem:[%s2442_s0 + $0x410] sm:$0xff]  ;;  %v1415_v1 = vld [vmem:[%s2442_s0 + $0x598] sm:$0xff] }
 0x107   :  { %v834_v9 = vmax.f32 %v712_v4, 0.0  ;;  %v1097_v10 = vmax.f32 %v975_v5, 0.0 }
 0x108   :  { %v139_v11 = vpop.f32.mrf.mxu0  ;;  %v402_v12 = vpop.f32.mrf.mxu1 }
 0x109   :  { %v1146_v15 = vmax.f32 %v834_v9, %v1097_v10  ;;  %761 = vmatmul.f32.gmra.mxu2 %v1363_v6  ;;  %1024 = vmatmul.f32.gmra.mxu3 %v1412_v7  ;;  %v140_v17 = vadd.f32 %v1698_v16, %v139_v11  ;;  %v403_v18 = vadd.f32 %v1698_v16, %v402_v12  ;;  %v63_v7 = vld [vmem:[%s2442_s0 + $0x100] sm:$0xff] }
 0x10b   :  { %v1195_v19 = vmax.f32 %v571_v8, %v1146_v15  ;;  %v260_v20 = vmax.f32 %v140_v17, 0.0  ;;  %v523_v21 = vmax.f32 %v403_v18, 0.0  ;;  %186 = vmatmul.f32.gmra.mxu0 %v60_v13  ;;  %449 = vmatmul.f32.gmra.mxu1 %v1314_v14  ;;  %v1317_v8 = vld [vmem:[%s2442_s0 + $0x288] sm:$0xff] }
 0x10c   :  { %v714_v22 = vpop.f32.mrf.mxu2  ;;  %v977_v23 = vpop.f32.mrf.mxu3 }
 0x10d   :  { %1244 = vst [vmem:[%s2444_s3 + $0x60] sm:$0xff] %v1195_v19  ;;  %v715_v24 = vadd.f32 %v1698_v16, %v714_v22  ;;  %v978_v25 = vadd.f32 %v1698_v16, %v977_v23  ;;  %v572_v28 = vmax.f32 %v260_v20, %v523_v21  ;;  %v1367_v20 = vld [vmem:[%s2442_s0 + $0x418] sm:$0xff]  ;;  %v1416_v21 = vld [vmem:[%s2442_s0 + $0x5a0] sm:$0xff] }
 0x10f   :  { %v835_v29 = vmax.f32 %v715_v24, 0.0  ;;  %v1098_v30 = vmax.f32 %v978_v25, 0.0 }
 0x110   :  { %v142_v31 = vpop.f32.mrf.mxu0  ;;  %v405_v32 = vpop.f32.mrf.mxu1 }
 0x111   :  { %v1147_v35 = vmax.f32 %v835_v29, %v1098_v30  ;;  %764 = vmatmul.f32.gmra.mxu2 %v1364_v26  ;;  %1027 = vmatmul.f32.gmra.mxu3 %v1413_v27  ;;  %v143_v36 = vadd.f32 %v1698_v16, %v142_v31  ;;  %v406_v37 = vadd.f32 %v1698_v16, %v405_v32  ;;  %v64_v27 = vld [vmem:[%s2442_s0 + $0x108] sm:$0xff] }
 0x113   :  { %v1196_v38 = vmax.f32 %v572_v28, %v1147_v35  ;;  %v261_v39 = vmax.f32 %v143_v36, 0.0  ;;  %v524_v40 = vmax.f32 %v406_v37, 0.0  ;;  %189 = vmatmul.f32.gmra.mxu0 %v61_v33  ;;  %452 = vmatmul.f32.gmra.mxu1 %v1315_v34  ;;  %v1318_v28 = vld [vmem:[%s2442_s0 + $0x290] sm:$0xff] }
 0x114   :  { %v717_v41 = vpop.f32.mrf.mxu2  ;;  %v980_v42 = vpop.f32.mrf.mxu3 }
 0x115   :  { %1245 = vst [vmem:[%s2444_s3 + $0x68] sm:$0xff] %v1196_v38  ;;  %v718_v43 = vadd.f32 %v1698_v16, %v717_v41  ;;  %v981_v44 = vadd.f32 %v1698_v16, %v980_v42  ;;  %v573_v47 = vmax.f32 %v261_v39, %v524_v40  ;;  %v1368_v39 = vld [vmem:[%s2442_s0 + $0x420] sm:$0xff]  ;;  %v1417_v40 = vld [vmem:[%s2442_s0 + $0x5a8] sm:$0xff] }
 0x117   :  { %v836_v48 = vmax.f32 %v718_v43, 0.0  ;;  %v1099_v49 = vmax.f32 %v981_v44, 0.0 }
 0x118   :  { %v145_v50 = vpop.f32.mrf.mxu0  ;;  %v408_v51 = vpop.f32.mrf.mxu1 }
 0x119   :  { %v1148_v54 = vmax.f32 %v836_v48, %v1099_v49  ;;  %767 = vmatmul.f32.gmra.mxu2 %v1365_v45  ;;  %1030 = vmatmul.f32.gmra.mxu3 %v1414_v46  ;;  %v146_v55 = vadd.f32 %v1698_v16, %v145_v50  ;;  %v409_v56 = vadd.f32 %v1698_v16, %v408_v51  ;;  %v65_v46 = vld [vmem:[%s2442_s0 + $0x110] sm:$0xff] }
 0x11b   :  { %v1197_v57 = vmax.f32 %v573_v47, %v1148_v54  ;;  %v262_v58 = vmax.f32 %v146_v55, 0.0  ;;  %v525_v59 = vmax.f32 %v409_v56, 0.0  ;;  %192 = vmatmul.f32.gmra.mxu0 %v62_v52  ;;  %455 = vmatmul.f32.gmra.mxu1 %v1316_v53  ;;  %v1319_v47 = vld [vmem:[%s2442_s0 + $0x298] sm:$0xff] }
 0x11c   :  { %v720_v60 = vpop.f32.mrf.mxu2  ;;  %v983_v61 = vpop.f32.mrf.mxu3 }
 0x11d   :  { %1246 = vst [vmem:[%s2444_s3 + $0x70] sm:$0xff] %v1197_v57  ;;  %v721_v62 = vadd.f32 %v1698_v16, %v720_v60  ;;  %v984_v63 = vadd.f32 %v1698_v16, %v983_v61  ;;  %v574_v2 = vmax.f32 %v262_v58, %v525_v59  ;;  %v1369_v58 = vld [vmem:[%s2442_s0 + $0x428] sm:$0xff]  ;;  %v1418_v59 = vld [vmem:[%s2442_s0 + $0x5b0] sm:$0xff] }
 0x11f   :  { %v837_v3 = vmax.f32 %v721_v62, 0.0  ;;  %v1100_v4 = vmax.f32 %v984_v63, 0.0 }
 0x120   :  { %v148_v5 = vpop.f32.mrf.mxu0  ;;  %v411_v6 = vpop.f32.mrf.mxu1 }
 0x121   :  { %v1149_v9 = vmax.f32 %v837_v3, %v1100_v4  ;;  %770 = vmatmul.f32.gmra.mxu2 %v1366_v0  ;;  %1033 = vmatmul.f32.gmra.mxu3 %v1415_v1  ;;  %v149_v10 = vadd.f32 %v1698_v16, %v148_v5  ;;  %v412_v11 = vadd.f32 %v1698_v16, %v411_v6  ;;  %v66_v1 = vld [vmem:[%s2442_s0 + $0x118] sm:$0xff] }
 0x123   :  { %v1198_v12 = vmax.f32 %v574_v2, %v1149_v9  ;;  %v263_v13 = vmax.f32 %v149_v10, 0.0  ;;  %v526_v14 = vmax.f32 %v412_v11, 0.0  ;;  %195 = vmatmul.f32.gmra.mxu0 %v63_v7  ;;  %458 = vmatmul.f32.gmra.mxu1 %v1317_v8  ;;  %v1320_v2 = vld [vmem:[%s2442_s0 + $0x2a0] sm:$0xff] }
 0x124   :  { %v723_v15 = vpop.f32.mrf.mxu2  ;;  %v986_v17 = vpop.f32.mrf.mxu3 }
 0x125   :  { %1247 = vst [vmem:[%s2444_s3 + $0x78] sm:$0xff] %v1198_v12  ;;  %v724_v18 = vadd.f32 %v1698_v16, %v723_v15  ;;  %v987_v19 = vadd.f32 %v1698_v16, %v986_v17  ;;  %v575_v22 = vmax.f32 %v263_v13, %v526_v14  ;;  %v1370_v13 = vld [vmem:[%s2442_s0 + $0x430] sm:$0xff]  ;;  %v1419_v14 = vld [vmem:[%s2442_s0 + $0x5b8] sm:$0xff] }
 0x127   :  { %v838_v23 = vmax.f32 %v724_v18, 0.0  ;;  %v1101_v24 = vmax.f32 %v987_v19, 0.0 }
 0x128   :  { %v151_v25 = vpop.f32.mrf.mxu0  ;;  %v414_v26 = vpop.f32.mrf.mxu1 }
 0x129   :  { %v1150_v29 = vmax.f32 %v838_v23, %v1101_v24  ;;  %773 = vmatmul.f32.gmra.mxu2 %v1367_v20  ;;  %1036 = vmatmul.f32.gmra.mxu3 %v1416_v21  ;;  %v152_v30 = vadd.f32 %v1698_v16, %v151_v25  ;;  %v415_v31 = vadd.f32 %v1698_v16, %v414_v26  ;;  %v67_v21 = vld [vmem:[%s2442_s0 + $0x120] sm:$0xff] }
 0x12b   :  { %v1199_v32 = vmax.f32 %v575_v22, %v1150_v29  ;;  %v264_v33 = vmax.f32 %v152_v30, 0.0  ;;  %v527_v34 = vmax.f32 %v415_v31, 0.0  ;;  %198 = vmatmul.f32.gmra.mxu0 %v64_v27  ;;  %461 = vmatmul.f32.gmra.mxu1 %v1318_v28  ;;  %v1321_v22 = vld [vmem:[%s2442_s0 + $0x2a8] sm:$0xff] }
 0x12c   :  { %v726_v35 = vpop.f32.mrf.mxu2  ;;  %v989_v36 = vpop.f32.mrf.mxu3 }
 0x12d   :  { %1248 = vst [vmem:[%s2444_s3 + $0x80] sm:$0xff] %v1199_v32  ;;  %v727_v37 = vadd.f32 %v1698_v16, %v726_v35  ;;  %v990_v38 = vadd.f32 %v1698_v16, %v989_v36  ;;  %v576_v41 = vmax.f32 %v264_v33, %v527_v34  ;;  %v1371_v33 = vld [vmem:[%s2442_s0 + $0x438] sm:$0xff]  ;;  %v1420_v34 = vld [vmem:[%s2442_s0 + $0x5c0] sm:$0xff] }
 0x12f   :  { %v839_v42 = vmax.f32 %v727_v37, 0.0  ;;  %v1102_v43 = vmax.f32 %v990_v38, 0.0 }
 0x130   :  { %v154_v44 = vpop.f32.mrf.mxu0  ;;  %v417_v45 = vpop.f32.mrf.mxu1 }
 0x131   :  { %v1151_v48 = vmax.f32 %v839_v42, %v1102_v43  ;;  %776 = vmatmul.f32.gmra.mxu2 %v1368_v39  ;;  %1039 = vmatmul.f32.gmra.mxu3 %v1417_v40  ;;  %v155_v49 = vadd.f32 %v1698_v16, %v154_v44  ;;  %v418_v50 = vadd.f32 %v1698_v16, %v417_v45  ;;  %v68_v40 = vld [vmem:[%s2442_s0 + $0x128] sm:$0xff]  ;;  %v2111_v42 = vld [vmem:[%s2443_s2] ss:$0 sm:$0xff] }
 0x133   :  { %v1200_v51 = vmax.f32 %v576_v41, %v1151_v48  ;;  %v265_v52 = vmax.f32 %v155_v49, 0.0  ;;  %v528_v53 = vmax.f32 %v418_v50, 0.0  ;;  %201 = vmatmul.f32.gmra.mxu0 %v65_v46  ;;  %464 = vmatmul.f32.gmra.mxu1 %v1319_v47 }
 0x134   :  { %v729_v54 = vpop.f32.mrf.mxu2  ;;  %v992_v55 = vpop.f32.mrf.mxu3 }
 0x135   :  { %1249 = vst [vmem:[%s2444_s3 + $0x88] sm:$0xff] %v1200_v51  ;;  %v730_v56 = vadd.f32 %v1698_v16, %v729_v54  ;;  %v993_v57 = vadd.f32 %v1698_v16, %v992_v55  ;;  %v577_v60 = vmax.f32 %v265_v52, %v528_v53  ;;  %v1372_v52 = vld [vmem:[%s2442_s0 + $0x440] sm:$0xff]  ;;  %v1421_v53 = vld [vmem:[%s2442_s0 + $0x5c8] sm:$0xff] }
 0x137   :  { %v840_v61 = vmax.f32 %v730_v56, 0.0  ;;  %v1103_v62 = vmax.f32 %v993_v57, 0.0 }
 0x138   :  { %v157_v63 = vpop.f32.mrf.mxu0  ;;  %v420_v0 = vpop.f32.mrf.mxu1 }
 0x139   :  { %v1152_v3 = vmax.f32 %v840_v61, %v1103_v62  ;;  %779 = vmatmul.f32.gmra.mxu2 %v1369_v58  ;;  %1042 = vmatmul.f32.gmra.mxu3 %v1418_v59  ;;  %v158_v4 = vadd.f32 %v1698_v16, %v157_v63  ;;  %v421_v5 = vadd.f32 %v1698_v16, %v420_v0  ;;  %v69_v59 = vld [vmem:[%s2442_s0 + $0x130] sm:$0xff] }
 0x13b   :  { %v1201_v6 = vmax.f32 %v577_v60, %v1152_v3  ;;  %v266_v7 = vmax.f32 %v158_v4, 0.0  ;;  %v529_v8 = vmax.f32 %v421_v5, 0.0  ;;  %204 = vmatmul.f32.gmra.mxu0 %v66_v1  ;;  %467 = vmatmul.f32.gmra.mxu1 %v1320_v2  ;;  %v1323_v60 = vld [vmem:[%s2442_s0 + $0x2b8] sm:$0xff] }
 0x13c   :  { %v732_v9 = vpop.f32.mrf.mxu2  ;;  %v995_v10 = vpop.f32.mrf.mxu3 }
 0x13d   :  { %1250 = vst [vmem:[%s2444_s3 + $0x90] sm:$0xff] %v1201_v6  ;;  %v733_v11 = vadd.f32 %v1698_v16, %v732_v9  ;;  %v996_v12 = vadd.f32 %v1698_v16, %v995_v10  ;;  %v578_v15 = vmax.f32 %v266_v7, %v529_v8  ;;  %v1373_v7 = vld [vmem:[%s2442_s0 + $0x448] sm:$0xff]  ;;  %v1422_v8 = vld [vmem:[%s2442_s0 + $0x5d0] sm:$0xff] }
 0x13f   :  { %v841_v17 = vmax.f32 %v733_v11, 0.0  ;;  %v1104_v18 = vmax.f32 %v996_v12, 0.0 }
 0x140   :  { %v160_v19 = vpop.f32.mrf.mxu0  ;;  %v423_v20 = vpop.f32.mrf.mxu1 }
 0x141   :  { %v1153_v23 = vmax.f32 %v841_v17, %v1104_v18  ;;  %782 = vmatmul.f32.gmra.mxu2 %v1370_v13  ;;  %1045 = vmatmul.f32.gmra.mxu3 %v1419_v14  ;;  %v161_v24 = vadd.f32 %v1698_v16, %v160_v19  ;;  %v424_v25 = vadd.f32 %v1698_v16, %v423_v20  ;;  %v70_v14 = vld [vmem:[%s2442_s0 + $0x138] sm:$0xff] }
 0x143   :  { %v1202_v26 = vmax.f32 %v578_v15, %v1153_v23  ;;  %v267_v27 = vmax.f32 %v161_v24, 0.0  ;;  %v530_v28 = vmax.f32 %v424_v25, 0.0  ;;  %207 = vmatmul.f32.gmra.mxu0 %v67_v21  ;;  %470 = vmatmul.f32.gmra.mxu1 %v1321_v22  ;;  %v1324_v15 = vld [vmem:[%s2442_s0 + $0x2c0] sm:$0xff] }
 0x144   :  { %v735_v29 = vpop.f32.mrf.mxu2  ;;  %v998_v30 = vpop.f32.mrf.mxu3 }
 0x145   :  { %1251 = vst [vmem:[%s2444_s3 + $0x98] sm:$0xff] %v1202_v26  ;;  %v736_v31 = vadd.f32 %v1698_v16, %v735_v29  ;;  %v999_v32 = vadd.f32 %v1698_v16, %v998_v30  ;;  %v579_v35 = vmax.f32 %v267_v27, %v530_v28  ;;  %v1322_v16 = vld [vmem:[%s2442_s0 + $0x2b0] sm:$0xff]  ;;  %v1423_v28 = vld [vmem:[%s2442_s0 + $0x5d8] sm:$0xff] }
 0x146   :  { %v1374_v27 = vld [vmem:[%s2442_s0 + $0x450] sm:$0xff] }
 0x147   :  { %v842_v36 = vmax.f32 %v736_v31, 0.0  ;;  %v1105_v37 = vmax.f32 %v999_v32, 0.0 }
 0x148   :  { %v163_v38 = vpop.f32.mrf.mxu0  ;;  %v426_v39 = vpop.f32.mrf.mxu1 }
 0x149   :  { %v1154_v41 = vmax.f32 %v842_v36, %v1105_v37  ;;  %785 = vmatmul.f32.gmra.mxu2 %v1371_v33  ;;  %1048 = vmatmul.f32.gmra.mxu3 %v1420_v34  ;;  %v164_v43 = vadd.f32 %v2111_v42, %v163_v38  ;;  %v427_v44 = vadd.f32 %v2111_v42, %v426_v39  ;;  %v71_v34 = vld [vmem:[%s2442_s0 + $0x140] sm:$0xff] }
 0x14b   :  { %v1203_v45 = vmax.f32 %v579_v35, %v1154_v41  ;;  %v268_v46 = vmax.f32 %v164_v43, 0.0  ;;  %v531_v47 = vmax.f32 %v427_v44, 0.0  ;;  %210 = vmatmul.f32.gmra.mxu0 %v68_v40  ;;  %473 = vmatmul.f32.gmra.mxu1 %v1322_v16  ;;  %v1325_v35 = vld [vmem:[%s2442_s0 + $0x2c8] sm:$0xff] }
 0x14c   :  { %v738_v48 = vpop.f32.mrf.mxu2  ;;  %v1001_v49 = vpop.f32.mrf.mxu3 }
 0x14d   :  { %1252 = vst [vmem:[%s2444_s3 + $0xa0] sm:$0xff] %v1203_v45  ;;  %v739_v50 = vadd.f32 %v2111_v42, %v738_v48  ;;  %v1002_v51 = vadd.f32 %v2111_v42, %v1001_v49  ;;  %v580_v54 = vmax.f32 %v268_v46, %v531_v47  ;;  %v1375_v46 = vld [vmem:[%s2442_s0 + $0x458] sm:$0xff]  ;;  %v1424_v47 = vld [vmem:[%s2442_s0 + $0x5e0] sm:$0xff] }
 0x14f   :  { %v843_v55 = vmax.f32 %v739_v50, 0.0  ;;  %v1106_v56 = vmax.f32 %v1002_v51, 0.0 }
 0x150   :  { %v166_v57 = vpop.f32.mrf.mxu0  ;;  %v429_v58 = vpop.f32.mrf.mxu1 }
 0x151   :  { %v1155_v61 = vmax.f32 %v843_v55, %v1106_v56  ;;  %788 = vmatmul.f32.gmra.mxu2 %v1372_v52  ;;  %1051 = vmatmul.f32.gmra.mxu3 %v1421_v53  ;;  %v167_v62 = vadd.f32 %v2111_v42, %v166_v57  ;;  %v430_v63 = vadd.f32 %v2111_v42, %v429_v58  ;;  %v72_v53 = vld [vmem:[%s2442_s0 + $0x148] sm:$0xff] }
 0x153   :  { %v1204_v0 = vmax.f32 %v580_v54, %v1155_v61  ;;  %v269_v1 = vmax.f32 %v167_v62, 0.0  ;;  %v532_v2 = vmax.f32 %v430_v63, 0.0  ;;  %213 = vmatmul.f32.gmra.mxu0 %v69_v59  ;;  %476 = vmatmul.f32.gmra.mxu1 %v1323_v60  ;;  %v1326_v54 = vld [vmem:[%s2442_s0 + $0x2d0] sm:$0xff] }
 0x154   :  { %v741_v3 = vpop.f32.mrf.mxu2  ;;  %v1004_v4 = vpop.f32.mrf.mxu3 }
 0x155   :  { %1253 = vst [vmem:[%s2444_s3 + $0xa8] sm:$0xff] %v1204_v0  ;;  %v742_v5 = vadd.f32 %v2111_v42, %v741_v3  ;;  %v1005_v6 = vadd.f32 %v2111_v42, %v1004_v4  ;;  %v581_v9 = vmax.f32 %v269_v1, %v532_v2  ;;  %v1376_v1 = vld [vmem:[%s2442_s0 + $0x460] sm:$0xff]  ;;  %v1425_v2 = vld [vmem:[%s2442_s0 + $0x5e8] sm:$0xff] }
 0x157   :  { %v844_v10 = vmax.f32 %v742_v5, 0.0  ;;  %v1107_v11 = vmax.f32 %v1005_v6, 0.0 }
 0x158   :  { %v169_v12 = vpop.f32.mrf.mxu0  ;;  %v432_v13 = vpop.f32.mrf.mxu1 }
 0x159   :  { %v1156_v17 = vmax.f32 %v844_v10, %v1107_v11  ;;  %791 = vmatmul.f32.gmra.mxu2 %v1373_v7  ;;  %1054 = vmatmul.f32.gmra.mxu3 %v1422_v8  ;;  %v170_v18 = vadd.f32 %v2111_v42, %v169_v12  ;;  %v433_v19 = vadd.f32 %v2111_v42, %v432_v13  ;;  %v73_v8 = vld [vmem:[%s2442_s0 + $0x150] sm:$0xff] }
 0x15b   :  { %v1205_v20 = vmax.f32 %v581_v9, %v1156_v17  ;;  %v270_v21 = vmax.f32 %v170_v18, 0.0  ;;  %v533_v22 = vmax.f32 %v433_v19, 0.0  ;;  %216 = vmatmul.f32.gmra.mxu0 %v70_v14  ;;  %479 = vmatmul.f32.gmra.mxu1 %v1324_v15  ;;  %v1327_v9 = vld [vmem:[%s2442_s0 + $0x2d8] sm:$0xff] }
 0x15c   :  { %v744_v23 = vpop.f32.mrf.mxu2  ;;  %v1007_v24 = vpop.f32.mrf.mxu3 }
 0x15d   :  { %1254 = vst [vmem:[%s2444_s3 + $0xb0] sm:$0xff] %v1205_v20  ;;  %v745_v25 = vadd.f32 %v2111_v42, %v744_v23  ;;  %v1008_v26 = vadd.f32 %v2111_v42, %v1007_v24  ;;  %v582_v29 = vmax.f32 %v270_v21, %v533_v22  ;;  %v1377_v21 = vld [vmem:[%s2442_s0 + $0x468] sm:$0xff]  ;;  %v1426_v22 = vld [vmem:[%s2442_s0 + $0x5f0] sm:$0xff] }
 0x15f   :  { %v845_v30 = vmax.f32 %v745_v25, 0.0  ;;  %v1108_v31 = vmax.f32 %v1008_v26, 0.0 }
 0x160   :  { %v172_v32 = vpop.f32.mrf.mxu0  ;;  %v435_v33 = vpop.f32.mrf.mxu1 }
 0x161   :  { %v1157_v36 = vmax.f32 %v845_v30, %v1108_v31  ;;  %794 = vmatmul.f32.gmra.mxu2 %v1374_v27  ;;  %1057 = vmatmul.f32.gmra.mxu3 %v1423_v28  ;;  %v173_v37 = vadd.f32 %v2111_v42, %v172_v32  ;;  %v436_v38 = vadd.f32 %v2111_v42, %v435_v33  ;;  %v74_v28 = vld [vmem:[%s2442_s0 + $0x158] sm:$0xff] }
 0x163   :  { %v1206_v39 = vmax.f32 %v582_v29, %v1157_v36  ;;  %v271_v40 = vmax.f32 %v173_v37, 0.0  ;;  %v534_v16 = vmax.f32 %v436_v38, 0.0  ;;  %219 = vmatmul.f32.gmra.mxu0 %v71_v34  ;;  %482 = vmatmul.f32.gmra.mxu1 %v1325_v35  ;;  %v1328_v29 = vld [vmem:[%s2442_s0 + $0x2e0] sm:$0xff] }
 0x164   :  { %v747_v41 = vpop.f32.mrf.mxu2  ;;  %v1010_v43 = vpop.f32.mrf.mxu3 }
 0x165   :  { %1255 = vst [vmem:[%s2444_s3 + $0xb8] sm:$0xff] %v1206_v39  ;;  %v748_v44 = vadd.f32 %v2111_v42, %v747_v41  ;;  %v1011_v45 = vadd.f32 %v2111_v42, %v1010_v43  ;;  %v583_v48 = vmax.f32 %v271_v40, %v534_v16  ;;  %v1378_v40 = vld [vmem:[%s2442_s0 + $0x470] sm:$0xff]  ;;  %v1427_v16 = vld [vmem:[%s2442_s0 + $0x5f8] sm:$0xff] }
 0x167   :  { %v846_v49 = vmax.f32 %v748_v44, 0.0  ;;  %v1109_v50 = vmax.f32 %v1011_v45, 0.0 }
 0x168   :  { %v175_v51 = vpop.f32.mrf.mxu0  ;;  %v438_v52 = vpop.f32.mrf.mxu1 }
 0x169   :  { %v1158_v55 = vmax.f32 %v846_v49, %v1109_v50  ;;  %797 = vmatmul.f32.gmra.mxu2 %v1375_v46  ;;  %1060 = vmatmul.f32.gmra.mxu3 %v1424_v47  ;;  %v176_v56 = vadd.f32 %v2111_v42, %v175_v51  ;;  %v439_v57 = vadd.f32 %v2111_v42, %v438_v52  ;;  %v75_v47 = vld [vmem:[%s2442_s0 + $0x160] sm:$0xff] }
 0x16b   :  { %v1207_v58 = vmax.f32 %v583_v48, %v1158_v55  ;;  %v272_v59 = vmax.f32 %v176_v56, 0.0  ;;  %v535_v60 = vmax.f32 %v439_v57, 0.0  ;;  %222 = vmatmul.f32.gmra.mxu0 %v72_v53  ;;  %485 = vmatmul.f32.gmra.mxu1 %v1326_v54  ;;  %v1329_v48 = vld [vmem:[%s2442_s0 + $0x2e8] sm:$0xff] }
 0x16c   :  { %v750_v61 = vpop.f32.mrf.mxu2  ;;  %v1013_v62 = vpop.f32.mrf.mxu3 }
 0x16d   :  { %1256 = vst [vmem:[%s2444_s3 + $0xc0] sm:$0xff] %v1207_v58  ;;  %v751_v63 = vadd.f32 %v2111_v42, %v750_v61  ;;  %v1014_v0 = vadd.f32 %v2111_v42, %v1013_v62  ;;  %v584_v3 = vmax.f32 %v272_v59, %v535_v60  ;;  %v1379_v59 = vld [vmem:[%s2442_s0 + $0x478] sm:$0xff]  ;;  %v1428_v60 = vld [vmem:[%s2442_s0 + $0x600] sm:$0xff] }
 0x16f   :  { %v847_v4 = vmax.f32 %v751_v63, 0.0  ;;  %v1110_v5 = vmax.f32 %v1014_v0, 0.0 }
 0x170   :  { %v178_v6 = vpop.f32.mrf.mxu0  ;;  %v441_v7 = vpop.f32.mrf.mxu1 }
 0x171   :  { %v1159_v10 = vmax.f32 %v847_v4, %v1110_v5  ;;  %800 = vmatmul.f32.gmra.mxu2 %v1376_v1  ;;  %1063 = vmatmul.f32.gmra.mxu3 %v1425_v2  ;;  %v179_v11 = vadd.f32 %v2111_v42, %v178_v6  ;;  %v442_v12 = vadd.f32 %v2111_v42, %v441_v7  ;;  %v76_v2 = vld [vmem:[%s2442_s0 + $0x168] sm:$0xff] }
 0x173   :  { %v1208_v13 = vmax.f32 %v584_v3, %v1159_v10  ;;  %v273_v14 = vmax.f32 %v179_v11, 0.0  ;;  %v536_v15 = vmax.f32 %v442_v12, 0.0  ;;  %225 = vmatmul.f32.gmra.mxu0 %v73_v8  ;;  %488 = vmatmul.f32.gmra.mxu1 %v1327_v9  ;;  %v1330_v3 = vld [vmem:[%s2442_s0 + $0x2f0] sm:$0xff] }
 0x174   :  { %v753_v17 = vpop.f32.mrf.mxu2  ;;  %v1016_v18 = vpop.f32.mrf.mxu3 }
 0x175   :  { %1257 = vst [vmem:[%s2444_s3 + $0xc8] sm:$0xff] %v1208_v13  ;;  %v754_v19 = vadd.f32 %v2111_v42, %v753_v17  ;;  %v1017_v20 = vadd.f32 %v2111_v42, %v1016_v18  ;;  %v585_v23 = vmax.f32 %v273_v14, %v536_v15  ;;  %v1380_v14 = vld [vmem:[%s2442_s0 + $0x480] sm:$0xff]  ;;  %v1429_v15 = vld [vmem:[%s2442_s0 + $0x608] sm:$0xff] }
 0x177   :  { %v848_v24 = vmax.f32 %v754_v19, 0.0  ;;  %v1111_v25 = vmax.f32 %v1017_v20, 0.0 }
 0x178   :  { %v181_v26 = vpop.f32.mrf.mxu0  ;;  %v444_v27 = vpop.f32.mrf.mxu1 }
 0x179   :  { %v1160_v30 = vmax.f32 %v848_v24, %v1111_v25  ;;  %803 = vmatmul.f32.gmra.mxu2 %v1377_v21  ;;  %1066 = vmatmul.f32.gmra.mxu3 %v1426_v22  ;;  %v182_v31 = vadd.f32 %v2111_v42, %v181_v26  ;;  %v445_v32 = vadd.f32 %v2111_v42, %v444_v27  ;;  %v77_v22 = vld [vmem:[%s2442_s0 + $0x170] sm:$0xff] }
 0x17b   :  { %v1209_v33 = vmax.f32 %v585_v23, %v1160_v30  ;;  %v274_v34 = vmax.f32 %v182_v31, 0.0  ;;  %v537_v35 = vmax.f32 %v445_v32, 0.0  ;;  %228 = vmatmul.f32.gmra.mxu0 %v74_v28  ;;  %491 = vmatmul.f32.gmra.mxu1 %v1328_v29  ;;  %v1331_v23 = vld [vmem:[%s2442_s0 + $0x2f8] sm:$0xff] }
 0x17c   :  { %v756_v36 = vpop.f32.mrf.mxu2  ;;  %v1019_v37 = vpop.f32.mrf.mxu3 }
 0x17d   :  { %1258 = vst [vmem:[%s2444_s3 + $0xd0] sm:$0xff] %v1209_v33  ;;  %v757_v38 = vadd.f32 %v2111_v42, %v756_v36  ;;  %v1020_v39 = vadd.f32 %v2111_v42, %v1019_v37  ;;  %v586_v41 = vmax.f32 %v274_v34, %v537_v35  ;;  %v1381_v34 = vld [vmem:[%s2442_s0 + $0x488] sm:$0xff]  ;;  %v1430_v35 = vld [vmem:[%s2442_s0 + $0x610] sm:$0xff] }
 0x17f   :  { %v849_v43 = vmax.f32 %v757_v38, 0.0  ;;  %v1112_v44 = vmax.f32 %v1020_v39, 0.0 }
 0x180   :  { %v184_v45 = vpop.f32.mrf.mxu0  ;;  %v447_v46 = vpop.f32.mrf.mxu1 }
 0x181   :  { %v1161_v49 = vmax.f32 %v849_v43, %v1112_v44  ;;  %806 = vmatmul.f32.gmra.mxu2 %v1378_v40  ;;  %1069 = vmatmul.f32.gmra.mxu3 %v1427_v16  ;;  %v185_v50 = vadd.f32 %v2111_v42, %v184_v45  ;;  %v448_v51 = vadd.f32 %v2111_v42, %v447_v46  ;;  %v78_v16 = vld [vmem:[%s2442_s0 + $0x178] sm:$0xff] }
 0x183   :  { %v1210_v52 = vmax.f32 %v586_v41, %v1161_v49  ;;  %v275_v53 = vmax.f32 %v185_v50, 0.0  ;;  %v538_v54 = vmax.f32 %v448_v51, 0.0  ;;  %231 = vmatmul.f32.gmra.mxu0 %v75_v47  ;;  %494 = vmatmul.f32.gmra.mxu1 %v1329_v48  ;;  %v1332_v41 = vld [vmem:[%s2442_s0 + $0x300] sm:$0xff] }
 0x184   :  { %v759_v55 = vpop.f32.mrf.mxu2  ;;  %v1022_v56 = vpop.f32.mrf.mxu3 }
 0x185   :  { %1259 = vst [vmem:[%s2444_s3 + $0xd8] sm:$0xff] %v1210_v52  ;;  %v760_v57 = vadd.f32 %v2111_v42, %v759_v55  ;;  %v1023_v58 = vadd.f32 %v2111_v42, %v1022_v56  ;;  %v587_v61 = vmax.f32 %v275_v53, %v538_v54  ;;  %v1382_v53 = vld [vmem:[%s2442_s0 + $0x490] sm:$0xff]  ;;  %v1431_v54 = vld [vmem:[%s2442_s0 + $0x618] sm:$0xff] }
 0x187   :  { %v850_v62 = vmax.f32 %v760_v57, 0.0  ;;  %v1113_v63 = vmax.f32 %v1023_v58, 0.0 }
 0x188   :  { %v187_v0 = vpop.f32.mrf.mxu0  ;;  %v450_v1 = vpop.f32.mrf.mxu1 }
 0x189   :  { %v1162_v4 = vmax.f32 %v850_v62, %v1113_v63  ;;  %809 = vmatmul.f32.gmra.mxu2 %v1379_v59  ;;  %1072 = vmatmul.f32.gmra.mxu3 %v1428_v60  ;;  %v188_v5 = vadd.f32 %v2111_v42, %v187_v0  ;;  %v451_v6 = vadd.f32 %v2111_v42, %v450_v1  ;;  %v79_v60 = vld [vmem:[%s2442_s0 + $0x180] sm:$0xff] }
 0x18b   :  { %v1211_v7 = vmax.f32 %v587_v61, %v1162_v4  ;;  %v276_v8 = vmax.f32 %v188_v5, 0.0  ;;  %v539_v9 = vmax.f32 %v451_v6, 0.0  ;;  %234 = vmatmul.f32.gmra.mxu0 %v76_v2  ;;  %497 = vmatmul.f32.gmra.mxu1 %v1330_v3  ;;  %v1333_v61 = vld [vmem:[%s2442_s0 + $0x308] sm:$0xff] }
 0x18c   :  { %v762_v10 = vpop.f32.mrf.mxu2  ;;  %v1025_v11 = vpop.f32.mrf.mxu3 }
 0x18d   :  { %1260 = vst [vmem:[%s2444_s3 + $0xe0] sm:$0xff] %v1211_v7  ;;  %v763_v12 = vadd.f32 %v2111_v42, %v762_v10  ;;  %v1026_v13 = vadd.f32 %v2111_v42, %v1025_v11  ;;  %v588_v17 = vmax.f32 %v276_v8, %v539_v9 }
 0x18f   :  { %v851_v18 = vmax.f32 %v763_v12, 0.0  ;;  %v1114_v19 = vmax.f32 %v1026_v13, 0.0 }
 0x190   :  { %v190_v20 = vpop.f32.mrf.mxu0  ;;  %v453_v21 = vpop.f32.mrf.mxu1 }
 0x191   :  { %v1163_v24 = vmax.f32 %v851_v18, %v1114_v19  ;;  %812 = vmatmul.f32.gmra.mxu2 %v1380_v14  ;;  %1075 = vmatmul.f32.gmra.mxu3 %v1429_v15  ;;  %v191_v25 = vadd.f32 %v2111_v42, %v190_v20  ;;  %v454_v26 = vadd.f32 %v2111_v42, %v453_v21 }
 0x193   :  { %v1212_v27 = vmax.f32 %v588_v17, %v1163_v24  ;;  %v277_v28 = vmax.f32 %v191_v25, 0.0  ;;  %v540_v29 = vmax.f32 %v454_v26, 0.0  ;;  %237 = vmatmul.f32.gmra.mxu0 %v77_v22  ;;  %500 = vmatmul.f32.gmra.mxu1 %v1331_v23 }
 0x194   :  { %v765_v30 = vpop.f32.mrf.mxu2  ;;  %v1028_v31 = vpop.f32.mrf.mxu3 }
 0x195   :  { %1261 = vst [vmem:[%s2444_s3 + $0xe8] sm:$0xff] %v1212_v27  ;;  %v766_v32 = vadd.f32 %v2111_v42, %v765_v30  ;;  %v1029_v33 = vadd.f32 %v2111_v42, %v1028_v31  ;;  %v589_v36 = vmax.f32 %v277_v28, %v540_v29 }
 0x197   :  { %v852_v37 = vmax.f32 %v766_v32, 0.0  ;;  %v1115_v38 = vmax.f32 %v1029_v33, 0.0 }
 0x198   :  { %v193_v39 = vpop.f32.mrf.mxu0  ;;  %v456_v40 = vpop.f32.mrf.mxu1 }
 0x199   :  { %v1164_v43 = vmax.f32 %v852_v37, %v1115_v38  ;;  %815 = vmatmul.f32.gmra.mxu2 %v1381_v34  ;;  %1078 = vmatmul.f32.gmra.mxu3 %v1430_v35  ;;  %v194_v44 = vadd.f32 %v2111_v42, %v193_v39  ;;  %v457_v45 = vadd.f32 %v2111_v42, %v456_v40 }
 0x19b   :  { %v1213_v46 = vmax.f32 %v589_v36, %v1164_v43  ;;  %v278_v47 = vmax.f32 %v194_v44, 0.0  ;;  %v541_v48 = vmax.f32 %v457_v45, 0.0  ;;  %240 = vmatmul.f32.gmra.mxu0 %v78_v16  ;;  %503 = vmatmul.f32.gmra.mxu1 %v1332_v41 }
 0x19c   :  { %v768_v49 = vpop.f32.mrf.mxu2  ;;  %v1031_v50 = vpop.f32.mrf.mxu3 }
 0x19d   :  { %1262 = vst [vmem:[%s2444_s3 + $0xf0] sm:$0xff] %v1213_v46  ;;  %v769_v51 = vadd.f32 %v2111_v42, %v768_v49  ;;  %v1032_v52 = vadd.f32 %v2111_v42, %v1031_v50  ;;  %v590_v55 = vmax.f32 %v278_v47, %v541_v48 }
 0x19f   :  { %v853_v56 = vmax.f32 %v769_v51, 0.0  ;;  %v1116_v57 = vmax.f32 %v1032_v52, 0.0 }
 0x1a0   :  { %v196_v58 = vpop.f32.mrf.mxu0  ;;  %v459_v59 = vpop.f32.mrf.mxu1 }
 0x1a1   :  { %v1165_v62 = vmax.f32 %v853_v56, %v1116_v57  ;;  %818 = vmatmul.f32.gmra.mxu2 %v1382_v53  ;;  %1081 = vmatmul.f32.gmra.mxu3 %v1431_v54  ;;  %v197_v63 = vadd.f32 %v2111_v42, %v196_v58  ;;  %v460_v0 = vadd.f32 %v2111_v42, %v459_v59 }
 0x1a3   :  { %v1214_v1 = vmax.f32 %v590_v55, %v1165_v62  ;;  %v279_v2 = vmax.f32 %v197_v63, 0.0  ;;  %v542_v3 = vmax.f32 %v460_v0, 0.0  ;;  %243 = vmatmul.f32.gmra.mxu0 %v79_v60  ;;  %506 = vmatmul.f32.gmra.mxu1 %v1333_v61 }
 0x1a4   :  { %v771_v4 = vpop.f32.mrf.mxu2  ;;  %v1034_v5 = vpop.f32.mrf.mxu3 }
 0x1a5   :  { %1263 = vst [vmem:[%s2444_s3 + $0xf8] sm:$0xff] %v1214_v1  ;;  %v772_v6 = vadd.f32 %v2111_v42, %v771_v4  ;;  %v1035_v7 = vadd.f32 %v2111_v42, %v1034_v5  ;;  %v591_v8 = vmax.f32 %v279_v2, %v542_v3 }
 0x1a7   :  { %v854_v9 = vmax.f32 %v772_v6, 0.0  ;;  %v1117_v10 = vmax.f32 %v1035_v7, 0.0 }
 0x1a8   :  { %v199_v11 = vpop.f32.mrf.mxu0  ;;  %v462_v12 = vpop.f32.mrf.mxu1 }
 0x1a9   :  { %v1166_v13 = vmax.f32 %v854_v9, %v1117_v10  ;;  %v200_v14 = vadd.f32 %v2111_v42, %v199_v11  ;;  %v463_v15 = vadd.f32 %v2111_v42, %v462_v12 }
 0x1ab   :  { %v1215_v17 = vmax.f32 %v591_v8, %v1166_v13  ;;  %v280_v18 = vmax.f32 %v200_v14, 0.0  ;;  %v543_v19 = vmax.f32 %v463_v15, 0.0 }
 0x1ac   :  { %v774_v20 = vpop.f32.mrf.mxu2  ;;  %v1037_v21 = vpop.f32.mrf.mxu3 }
 0x1ad   :  { %1264 = vst [vmem:[%s2444_s3 + $0x100] sm:$0xff] %v1215_v17  ;;  %v775_v22 = vadd.f32 %v2111_v42, %v774_v20  ;;  %v1038_v23 = vadd.f32 %v2111_v42, %v1037_v21  ;;  %v592_v24 = vmax.f32 %v280_v18, %v543_v19 }
 0x1af   :  { %v855_v25 = vmax.f32 %v775_v22, 0.0  ;;  %v1118_v26 = vmax.f32 %v1038_v23, 0.0 }
 0x1b0   :  { %v202_v27 = vpop.f32.mrf.mxu0  ;;  %v465_v28 = vpop.f32.mrf.mxu1 }
 0x1b1   :  { %v1167_v29 = vmax.f32 %v855_v25, %v1118_v26  ;;  %v203_v30 = vadd.f32 %v2111_v42, %v202_v27  ;;  %v466_v31 = vadd.f32 %v2111_v42, %v465_v28 }
 0x1b3   :  { %v1216_v32 = vmax.f32 %v592_v24, %v1167_v29  ;;  %v281_v33 = vmax.f32 %v203_v30, 0.0  ;;  %v544_v34 = vmax.f32 %v466_v31, 0.0 }
 0x1b4   :  { %v777_v35 = vpop.f32.mrf.mxu2  ;;  %v1040_v36 = vpop.f32.mrf.mxu3 }
 0x1b5   :  { %1265 = vst [vmem:[%s2444_s3 + $0x108] sm:$0xff] %v1216_v32  ;;  %v778_v37 = vadd.f32 %v2111_v42, %v777_v35  ;;  %v1041_v38 = vadd.f32 %v2111_v42, %v1040_v36  ;;  %v593_v39 = vmax.f32 %v281_v33, %v544_v34 }
 0x1b7   :  { %v856_v40 = vmax.f32 %v778_v37, 0.0  ;;  %v1119_v16 = vmax.f32 %v1041_v38, 0.0 }
 0x1b8   :  { %v205_v41 = vpop.f32.mrf.mxu0  ;;  %v468_v43 = vpop.f32.mrf.mxu1 }
 0x1b9   :  { %v1168_v44 = vmax.f32 %v856_v40, %v1119_v16  ;;  %v206_v45 = vadd.f32 %v2111_v42, %v205_v41  ;;  %v469_v46 = vadd.f32 %v2111_v42, %v468_v43 }
 0x1bb   :  { %v1217_v47 = vmax.f32 %v593_v39, %v1168_v44  ;;  %v282_v48 = vmax.f32 %v206_v45, 0.0  ;;  %v545_v49 = vmax.f32 %v469_v46, 0.0 }
 0x1bc   :  { %v780_v50 = vpop.f32.mrf.mxu2  ;;  %v1043_v51 = vpop.f32.mrf.mxu3 }
 0x1bd   :  { %1266 = vst [vmem:[%s2444_s3 + $0x110] sm:$0xff] %v1217_v47  ;;  %v781_v52 = vadd.f32 %v2111_v42, %v780_v50  ;;  %v1044_v53 = vadd.f32 %v2111_v42, %v1043_v51  ;;  %v594_v54 = vmax.f32 %v282_v48, %v545_v49 }
 0x1bf   :  { %v857_v55 = vmax.f32 %v781_v52, 0.0  ;;  %v1120_v56 = vmax.f32 %v1044_v53, 0.0 }
 0x1c0   :  { %v208_v57 = vpop.f32.mrf.mxu0  ;;  %v471_v58 = vpop.f32.mrf.mxu1 }
 0x1c1   :  { %v1169_v59 = vmax.f32 %v857_v55, %v1120_v56  ;;  %v209_v60 = vadd.f32 %v2111_v42, %v208_v57  ;;  %v472_v61 = vadd.f32 %v2111_v42, %v471_v58 }
 0x1c3   :  { %v1218_v62 = vmax.f32 %v594_v54, %v1169_v59  ;;  %v283_v63 = vmax.f32 %v209_v60, 0.0  ;;  %v546_v0 = vmax.f32 %v472_v61, 0.0 }
 0x1c4   :  { %v783_v1 = vpop.f32.mrf.mxu2  ;;  %v1046_v2 = vpop.f32.mrf.mxu3 }
 0x1c5   :  { %1267 = vst [vmem:[%s2444_s3 + $0x118] sm:$0xff] %v1218_v62  ;;  %v784_v3 = vadd.f32 %v2111_v42, %v783_v1  ;;  %v1047_v4 = vadd.f32 %v2111_v42, %v1046_v2  ;;  %v595_v5 = vmax.f32 %v283_v63, %v546_v0 }
 0x1c7   :  { %v858_v6 = vmax.f32 %v784_v3, 0.0  ;;  %v1121_v7 = vmax.f32 %v1047_v4, 0.0 }
 0x1c8   :  { %v211_v8 = vpop.f32.mrf.mxu0  ;;  %v474_v9 = vpop.f32.mrf.mxu1 }
 0x1c9   :  { %v1170_v10 = vmax.f32 %v858_v6, %v1121_v7  ;;  %v212_v11 = vadd.f32 %v2111_v42, %v211_v8  ;;  %v475_v12 = vadd.f32 %v2111_v42, %v474_v9 }
 0x1cb   :  { %v1219_v13 = vmax.f32 %v595_v5, %v1170_v10  ;;  %v284_v14 = vmax.f32 %v212_v11, 0.0  ;;  %v547_v15 = vmax.f32 %v475_v12, 0.0 }
 0x1cc   :  { %v786_v17 = vpop.f32.mrf.mxu2  ;;  %v1049_v18 = vpop.f32.mrf.mxu3 }
 0x1cd   :  { %1268 = vst [vmem:[%s2444_s3 + $0x120] sm:$0xff] %v1219_v13  ;;  %v787_v19 = vadd.f32 %v2111_v42, %v786_v17  ;;  %v1050_v20 = vadd.f32 %v2111_v42, %v1049_v18  ;;  %v596_v21 = vmax.f32 %v284_v14, %v547_v15 }
 0x1cf   :  { %v859_v22 = vmax.f32 %v787_v19, 0.0  ;;  %v1122_v23 = vmax.f32 %v1050_v20, 0.0 }
 0x1d0   :  { %v214_v24 = vpop.f32.mrf.mxu0  ;;  %v477_v25 = vpop.f32.mrf.mxu1 }
 0x1d1   :  { %v1171_v26 = vmax.f32 %v859_v22, %v1122_v23  ;;  %v215_v27 = vadd.f32 %v2111_v42, %v214_v24  ;;  %v478_v28 = vadd.f32 %v2111_v42, %v477_v25 }
 0x1d3   :  { %v1220_v29 = vmax.f32 %v596_v21, %v1171_v26  ;;  %v285_v30 = vmax.f32 %v215_v27, 0.0  ;;  %v548_v31 = vmax.f32 %v478_v28, 0.0 }
 0x1d4   :  { %v789_v32 = vpop.f32.mrf.mxu2  ;;  %v1052_v33 = vpop.f32.mrf.mxu3 }
 0x1d5   :  { %1269 = vst [vmem:[%s2444_s3 + $0x128] sm:$0xff] %v1220_v29  ;;  %v790_v34 = vadd.f32 %v2111_v42, %v789_v32  ;;  %v1053_v35 = vadd.f32 %v2111_v42, %v1052_v33  ;;  %v597_v36 = vmax.f32 %v285_v30, %v548_v31 }
 0x1d7   :  { %v860_v37 = vmax.f32 %v790_v34, 0.0  ;;  %v1123_v38 = vmax.f32 %v1053_v35, 0.0 }
 0x1d8   :  { %v217_v39 = vpop.f32.mrf.mxu0  ;;  %v480_v40 = vpop.f32.mrf.mxu1 }
 0x1d9   :  { %v1172_v16 = vmax.f32 %v860_v37, %v1123_v38  ;;  %v218_v41 = vadd.f32 %v2111_v42, %v217_v39  ;;  %v481_v43 = vadd.f32 %v2111_v42, %v480_v40 }
 0x1db   :  { %v1221_v44 = vmax.f32 %v597_v36, %v1172_v16  ;;  %v286_v45 = vmax.f32 %v218_v41, 0.0  ;;  %v549_v46 = vmax.f32 %v481_v43, 0.0 }
 0x1dc   :  { %v792_v47 = vpop.f32.mrf.mxu2  ;;  %v1055_v48 = vpop.f32.mrf.mxu3 }
 0x1dd   :  { %1270 = vst [vmem:[%s2444_s3 + $0x130] sm:$0xff] %v1221_v44  ;;  %v793_v49 = vadd.f32 %v2111_v42, %v792_v47  ;;  %v1056_v50 = vadd.f32 %v2111_v42, %v1055_v48  ;;  %v598_v51 = vmax.f32 %v286_v45, %v549_v46 }
 0x1df   :  { %v861_v52 = vmax.f32 %v793_v49, 0.0  ;;  %v1124_v53 = vmax.f32 %v1056_v50, 0.0 }
 0x1e0   :  { %v220_v54 = vpop.f32.mrf.mxu0  ;;  %v483_v55 = vpop.f32.mrf.mxu1 }
 0x1e1   :  { %v1173_v56 = vmax.f32 %v861_v52, %v1124_v53  ;;  %v221_v57 = vadd.f32 %v2111_v42, %v220_v54  ;;  %v484_v58 = vadd.f32 %v2111_v42, %v483_v55 }
 0x1e3   :  { %v1222_v59 = vmax.f32 %v598_v51, %v1173_v56  ;;  %v287_v60 = vmax.f32 %v221_v57, 0.0  ;;  %v550_v61 = vmax.f32 %v484_v58, 0.0 }
 0x1e4   :  { %v795_v62 = vpop.f32.mrf.mxu2  ;;  %v1058_v63 = vpop.f32.mrf.mxu3 }
 0x1e5   :  { %1271 = vst [vmem:[%s2444_s3 + $0x138] sm:$0xff] %v1222_v59  ;;  %v796_v0 = vadd.f32 %v2111_v42, %v795_v62  ;;  %v1059_v1 = vadd.f32 %v2111_v42, %v1058_v63  ;;  %v599_v2 = vmax.f32 %v287_v60, %v550_v61 }
 0x1e7   :  { %v862_v3 = vmax.f32 %v796_v0, 0.0  ;;  %v1125_v4 = vmax.f32 %v1059_v1, 0.0 }
 0x1e8   :  { %v223_v5 = vpop.f32.mrf.mxu0  ;;  %v486_v6 = vpop.f32.mrf.mxu1 }
 0x1e9   :  { %v1174_v7 = vmax.f32 %v862_v3, %v1125_v4  ;;  %v224_v8 = vadd.f32 %v2111_v42, %v223_v5  ;;  %v487_v9 = vadd.f32 %v2111_v42, %v486_v6 }
 0x1eb   :  { %v1223_v10 = vmax.f32 %v599_v2, %v1174_v7  ;;  %v288_v11 = vmax.f32 %v224_v8, 0.0  ;;  %v551_v12 = vmax.f32 %v487_v9, 0.0 }
 0x1ec   :  { %v798_v13 = vpop.f32.mrf.mxu2  ;;  %v1061_v14 = vpop.f32.mrf.mxu3 }
 0x1ed   :  { %1272 = vst [vmem:[%s2444_s3 + $0x140] sm:$0xff] %v1223_v10  ;;  %v799_v15 = vadd.f32 %v2111_v42, %v798_v13  ;;  %v1062_v17 = vadd.f32 %v2111_v42, %v1061_v14  ;;  %v600_v18 = vmax.f32 %v288_v11, %v551_v12 }
 0x1ef   :  { %v863_v19 = vmax.f32 %v799_v15, 0.0  ;;  %v1126_v20 = vmax.f32 %v1062_v17, 0.0 }
 0x1f0   :  { %v226_v21 = vpop.f32.mrf.mxu0  ;;  %v489_v22 = vpop.f32.mrf.mxu1 }
 0x1f1   :  { %v1175_v23 = vmax.f32 %v863_v19, %v1126_v20  ;;  %v227_v24 = vadd.f32 %v2111_v42, %v226_v21  ;;  %v490_v25 = vadd.f32 %v2111_v42, %v489_v22 }
 0x1f3   :  { %v1224_v26 = vmax.f32 %v600_v18, %v1175_v23  ;;  %v289_v27 = vmax.f32 %v227_v24, 0.0  ;;  %v552_v28 = vmax.f32 %v490_v25, 0.0 }
 0x1f4   :  { %v801_v29 = vpop.f32.mrf.mxu2  ;;  %v1064_v30 = vpop.f32.mrf.mxu3 }
 0x1f5   :  { %1273 = vst [vmem:[%s2444_s3 + $0x148] sm:$0xff] %v1224_v26  ;;  %v802_v31 = vadd.f32 %v2111_v42, %v801_v29  ;;  %v1065_v32 = vadd.f32 %v2111_v42, %v1064_v30  ;;  %v601_v33 = vmax.f32 %v289_v27, %v552_v28 }
 0x1f7   :  { %v864_v34 = vmax.f32 %v802_v31, 0.0  ;;  %v1127_v35 = vmax.f32 %v1065_v32, 0.0 }
 0x1f8   :  { %v229_v36 = vpop.f32.mrf.mxu0  ;;  %v492_v37 = vpop.f32.mrf.mxu1 }
 0x1f9   :  { %v1176_v38 = vmax.f32 %v864_v34, %v1127_v35  ;;  %v230_v39 = vadd.f32 %v2111_v42, %v229_v36  ;;  %v493_v40 = vadd.f32 %v2111_v42, %v492_v37 }
 0x1fb   :  { %v1225_v16 = vmax.f32 %v601_v33, %v1176_v38  ;;  %v290_v41 = vmax.f32 %v230_v39, 0.0  ;;  %v553_v43 = vmax.f32 %v493_v40, 0.0 }
 0x1fc   :  { %v804_v44 = vpop.f32.mrf.mxu2  ;;  %v1067_v45 = vpop.f32.mrf.mxu3 }
 0x1fd   :  { %1274 = vst [vmem:[%s2444_s3 + $0x150] sm:$0xff] %v1225_v16  ;;  %v805_v46 = vadd.f32 %v2111_v42, %v804_v44  ;;  %v1068_v47 = vadd.f32 %v2111_v42, %v1067_v45  ;;  %v602_v48 = vmax.f32 %v290_v41, %v553_v43  ;;  %v1434_v43 = vld [vmem:[%s2443_s2] ss:$0 sm:$0xff] }
 0x1ff   :  { %v865_v49 = vmax.f32 %v805_v46, 0.0  ;;  %v1128_v50 = vmax.f32 %v1068_v47, 0.0 }
 0x200   :  { %v232_v51 = vpop.f32.mrf.mxu0  ;;  %v495_v52 = vpop.f32.mrf.mxu1 }
 0x201   :  { %v1177_v53 = vmax.f32 %v865_v49, %v1128_v50  ;;  %v233_v54 = vadd.f32 %v2111_v42, %v232_v51  ;;  %v496_v55 = vadd.f32 %v2111_v42, %v495_v52 }
 0x203   :  { %v1226_v56 = vmax.f32 %v602_v48, %v1177_v53  ;;  %v291_v57 = vmax.f32 %v233_v54, 0.0  ;;  %v554_v58 = vmax.f32 %v496_v55, 0.0 }
 0x204   :  { %v807_v59 = vpop.f32.mrf.mxu2  ;;  %v1070_v60 = vpop.f32.mrf.mxu3 }
 0x205   :  { %1275 = vst [vmem:[%s2444_s3 + $0x158] sm:$0xff] %v1226_v56  ;;  %v808_v61 = vadd.f32 %v2111_v42, %v807_v59  ;;  %v1071_v62 = vadd.f32 %v2111_v42, %v1070_v60  ;;  %v603_v63 = vmax.f32 %v291_v57, %v554_v58 }
 0x207   :  { %v866_v0 = vmax.f32 %v808_v61, 0.0  ;;  %v1129_v1 = vmax.f32 %v1071_v62, 0.0 }
 0x208   :  { %v235_v2 = vpop.f32.mrf.mxu0  ;;  %v498_v3 = vpop.f32.mrf.mxu1 }
 0x209   :  { %v1178_v4 = vmax.f32 %v866_v0, %v1129_v1  ;;  %v236_v5 = vadd.f32 %v2111_v42, %v235_v2  ;;  %v499_v6 = vadd.f32 %v2111_v42, %v498_v3 }
 0x20b   :  { %v1227_v7 = vmax.f32 %v603_v63, %v1178_v4  ;;  %v292_v8 = vmax.f32 %v236_v5, 0.0  ;;  %v555_v9 = vmax.f32 %v499_v6, 0.0 }
 0x20c   :  { %v810_v10 = vpop.f32.mrf.mxu2  ;;  %v1073_v11 = vpop.f32.mrf.mxu3 }
 0x20d   :  { %1276 = vst [vmem:[%s2444_s3 + $0x160] sm:$0xff] %v1227_v7  ;;  %v811_v12 = vadd.f32 %v2111_v42, %v810_v10  ;;  %v1074_v13 = vadd.f32 %v2111_v42, %v1073_v11  ;;  %v604_v14 = vmax.f32 %v292_v8, %v555_v9 }
 0x20f   :  { %v867_v15 = vmax.f32 %v811_v12, 0.0  ;;  %v1130_v17 = vmax.f32 %v1074_v13, 0.0 }
 0x210   :  { %v238_v18 = vpop.f32.mrf.mxu0  ;;  %v501_v19 = vpop.f32.mrf.mxu1 }
 0x211   :  { %v1179_v20 = vmax.f32 %v867_v15, %v1130_v17  ;;  %v239_v21 = vadd.f32 %v2111_v42, %v238_v18  ;;  %v502_v22 = vadd.f32 %v2111_v42, %v501_v19 }
 0x213   :  { %v1228_v23 = vmax.f32 %v604_v14, %v1179_v20  ;;  %v293_v24 = vmax.f32 %v239_v21, 0.0  ;;  %v556_v25 = vmax.f32 %v502_v22, 0.0 }
 0x214   :  { %v813_v26 = vpop.f32.mrf.mxu2  ;;  %v1076_v27 = vpop.f32.mrf.mxu3 }
 0x215   :  { %1277 = vst [vmem:[%s2444_s3 + $0x168] sm:$0xff] %v1228_v23  ;;  %v814_v28 = vadd.f32 %v2111_v42, %v813_v26  ;;  %v1077_v29 = vadd.f32 %v2111_v42, %v1076_v27  ;;  %v605_v30 = vmax.f32 %v293_v24, %v556_v25 }
 0x217   :  { %v868_v31 = vmax.f32 %v814_v28, 0.0  ;;  %v1131_v32 = vmax.f32 %v1077_v29, 0.0 }
 0x218   :  { %v241_v33 = vpop.f32.mrf.mxu0  ;;  %v504_v34 = vpop.f32.mrf.mxu1 }
 0x219   :  { %v1180_v35 = vmax.f32 %v868_v31, %v1131_v32  ;;  %v242_v36 = vadd.f32 %v2111_v42, %v241_v33  ;;  %v505_v37 = vadd.f32 %v2111_v42, %v504_v34 }
 0x21b   :  { %v1229_v38 = vmax.f32 %v605_v30, %v1180_v35  ;;  %v294_v39 = vmax.f32 %v242_v36, 0.0  ;;  %v557_v40 = vmax.f32 %v505_v37, 0.0 }
 0x21c   :  { %v816_v16 = vpop.f32.mrf.mxu2  ;;  %v1079_v41 = vpop.f32.mrf.mxu3 }
 0x21d   :  { %1278 = vst [vmem:[%s2444_s3 + $0x170] sm:$0xff] %v1229_v38  ;;  %v817_v44 = vadd.f32 %v1434_v43, %v816_v16  ;;  %v1080_v45 = vadd.f32 %v1434_v43, %v1079_v41  ;;  %v606_v46 = vmax.f32 %v294_v39, %v557_v40 }
 0x21f   :  { %v869_v47 = vmax.f32 %v817_v44, 0.0  ;;  %v1132_v48 = vmax.f32 %v1080_v45, 0.0 }
 0x220   :  { %v244_v49 = vpop.f32.mrf.mxu0  ;;  %v507_v42 = vpop.f32.mrf.mxu1 }
 0x221   :  { %v1181_v50 = vmax.f32 %v869_v47, %v1132_v48  ;;  %v245_v51 = vadd.f32 %v1434_v43, %v244_v49  ;;  %v508_v52 = vadd.f32 %v1434_v43, %v507_v42 }
 0x223   :  { %v1230_v53 = vmax.f32 %v606_v46, %v1181_v50  ;;  %v295_v54 = vmax.f32 %v245_v51, 0.0  ;;  %v558_v55 = vmax.f32 %v508_v52, 0.0 }
 0x224   :  { %v819_v56 = vpop.f32.mrf.mxu2  ;;  %v1082_v57 = vpop.f32.mrf.mxu3 }
 0x225   :  { %1279 = vst [vmem:[%s2444_s3 + $0x178] sm:$0xff] %v1230_v53  ;;  %v820_v58 = vadd.f32 %v1434_v43, %v819_v56  ;;  %v1083_v59 = vadd.f32 %v1434_v43, %v1082_v57  ;;  %v607_v60 = vmax.f32 %v295_v54, %v558_v55 }
 0x227   :  { %v870_v61 = vmax.f32 %v820_v58, 0.0  ;;  %v1133_v62 = vmax.f32 %v1083_v59, 0.0 }
 0x229   :  { %v1182_v63 = vmax.f32 %v870_v61, %v1133_v62 }
 0x22b   :  { %v1231_v0 = vmax.f32 %v607_v60, %v1182_v63 }
 0x22d   :  { %1280 = vst [vmem:[%s2444_s3 + $0x180] sm:$0xff] %v1231_v0 }

// kernel: cifar10_cnn_forward.4
= control target key start
LH: loop header
LB: loop body
LE: loop exit
PB: predicated region body
PF: predicated region fallthrough
CT: control target
= control target key end

     0   :  { %s1094_s1 = inlined_call_operand.vmem [shape: f32[256,128], index: 1, kind: input, shape index: {}]   ;;  %s1095_s2 = inlined_call_operand.vmem [shape: f32[1,128], index: 2, kind: input, shape index: {}]   ;;  %s1096_s0 = inlined_call_operand.vmem [shape: f32[4,50,256], index: 0, kind: input, shape index: {}]   ;;  %s1097_s3 = inlined_call_operand.vmem [shape: f32[50,128], index: 3, kind: output, shape index: {}]  }
   0x1   :  { %v539_v0 = vld [vmem:[%s1094_s1 + $0x78] sm:$0xff]  ;;  %v544_v1 = vld [vmem:[%s1094_s1 + $0x70] sm:$0xff]  ;;  %v561_v4 = vld [vmem:[%s1094_s1 + $0x68] sm:$0xff] }
   0x2   :  { %v549_v2 = vld [vmem:[%s1094_s1 + $0xf8] sm:$0xff]  ;;  %162 = vmatpush.msra.mxu2 %v539_v0  ;;  %v556_v3 = vld [vmem:[%s1094_s1 + $0xf0] sm:$0xff]  ;;  %64 = vmatpush.msra.mxu0 %v539_v0  ;;  %v567_v5 = vld [vmem:[%s1094_s1 + $0xe8] sm:$0xff] }
   0x3   :  { %200 = vmatpush.msra.mxu3 %v549_v2  ;;  %102 = vmatpush.msra.mxu1 %v549_v2  ;;  %v575_v6 = vld [vmem:[%s1094_s1 + $0x60] sm:$0xff]  ;;  %v589_v8 = vld [vmem:[%s1094_s1 + $0x58] sm:$0xff]  ;;  %v603_v10 = vld [vmem:[%s1094_s1 + $0x50] sm:$0xff] }
   0x4   :  { %163 = vmatpush.msra.mxu2 %v544_v1  ;;  %65 = vmatpush.msra.mxu0 %v544_v1  ;;  %v581_v7 = vld [vmem:[%s1094_s1 + $0xe0] sm:$0xff]  ;;  %v595_v9 = vld [vmem:[%s1094_s1 + $0xd8] sm:$0xff]  ;;  %v609_v11 = vld [vmem:[%s1094_s1 + $0xd0] sm:$0xff] }
   0x5   :  { %201 = vmatpush.msra.mxu3 %v556_v3  ;;  %103 = vmatpush.msra.mxu1 %v556_v3  ;;  %v617_v12 = vld [vmem:[%s1094_s1 + $0x48] sm:$0xff]  ;;  %v631_v14 = vld [vmem:[%s1094_s1 + $0x40] sm:$0xff]  ;;  %v645_v16 = vld [vmem:[%s1094_s1 + $0x38] sm:$0xff] }
   0x6   :  { %164 = vmatpush.msra.mxu2 %v561_v4  ;;  %66 = vmatpush.msra.mxu0 %v561_v4  ;;  %v623_v13 = vld [vmem:[%s1094_s1 + $0xc8] sm:$0xff]  ;;  %v637_v15 = vld [vmem:[%s1094_s1 + $0xc0] sm:$0xff]  ;;  %v651_v17 = vld [vmem:[%s1094_s1 + $0xb8] sm:$0xff] }
   0x7   :  { %202 = vmatpush.msra.mxu3 %v567_v5  ;;  %104 = vmatpush.msra.mxu1 %v567_v5  ;;  %v659_v18 = vld [vmem:[%s1094_s1 + $0x30] sm:$0xff]  ;;  %v673_v20 = vld [vmem:[%s1094_s1 + $0x28] sm:$0xff]  ;;  %v687_v22 = vld [vmem:[%s1094_s1 + $0x20] sm:$0xff] }
   0x8   :  { %165 = vmatpush.msra.mxu2 %v575_v6  ;;  %67 = vmatpush.msra.mxu0 %v575_v6  ;;  %v665_v19 = vld [vmem:[%s1094_s1 + $0xb0] sm:$0xff]  ;;  %v679_v21 = vld [vmem:[%s1094_s1 + $0xa8] sm:$0xff]  ;;  %v693_v23 = vld [vmem:[%s1094_s1 + $0xa0] sm:$0xff] }
   0x9   :  { %203 = vmatpush.msra.mxu3 %v581_v7  ;;  %105 = vmatpush.msra.mxu1 %v581_v7  ;;  %v701_v24 = vld [vmem:[%s1094_s1 + $0x18] sm:$0xff]  ;;  %v715_v26 = vld [vmem:[%s1094_s1 + $0x10] sm:$0xff]  ;;  %v729_v28 = vld [vmem:[%s1094_s1 + $0x8] sm:$0xff] }
   0xa   :  { %166 = vmatpush.msra.mxu2 %v589_v8  ;;  %68 = vmatpush.msra.mxu0 %v589_v8  ;;  %v707_v25 = vld [vmem:[%s1094_s1 + $0x98] sm:$0xff]  ;;  %v721_v27 = vld [vmem:[%s1094_s1 + $0x90] sm:$0xff]  ;;  %v735_v29 = vld [vmem:[%s1094_s1 + $0x88] sm:$0xff] }
   0xb   :  { %204 = vmatpush.msra.mxu3 %v595_v9  ;;  %106 = vmatpush.msra.mxu1 %v595_v9  ;;  %v743_v30 = vld [vmem:[%s1094_s1] sm:$0xff]  ;;  %v473_v32 = vld [vmem:[%s1096_s0 + $0x70] sm:$0xff]  ;;  %v474_v33 = vld [vmem:[%s1096_s0 + $0x78] sm:$0xff] }
   0xc   :  { %167 = vmatpush.msra.mxu2 %v603_v10  ;;  %69 = vmatpush.msra.mxu0 %v603_v10  ;;  %v749_v31 = vld [vmem:[%s1094_s1 + $0x80] sm:$0xff]  ;;  %v48_v35 = vld [vmem:[%s1096_s0 + $0x8] sm:$0xff]  ;;  %v49_v38 = vld [vmem:[%s1096_s0 + $0x10] sm:$0xff] }
   0xd   :  { %205 = vmatpush.msra.mxu3 %v609_v11  ;;  %107 = vmatpush.msra.mxu1 %v609_v11  ;;  %v47_v34 = vld [vmem:[%s1096_s0] sm:$0xff]  ;;  %v476_v37 = vld [vmem:[%s1096_s0 + $0x88] sm:$0xff]  ;;  %v50_v39 = vld [vmem:[%s1096_s0 + $0x18] sm:$0xff] }
   0xe   :  { %168 = vmatpush.msra.mxu2 %v617_v12  ;;  %70 = vmatpush.msra.mxu0 %v617_v12  ;;  %v475_v36 = vld [vmem:[%s1096_s0 + $0x80] sm:$0xff]  ;;  %v477_v40 = vld [vmem:[%s1096_s0 + $0x90] sm:$0xff]  ;;  %v478_v41 = vld [vmem:[%s1096_s0 + $0x98] sm:$0xff] }
   0xf   :  { %206 = vmatpush.msra.mxu3 %v623_v13  ;;  %108 = vmatpush.msra.mxu1 %v623_v13  ;;  %v51_v42 = vld [vmem:[%s1096_s0 + $0x20] sm:$0xff]  ;;  %v52_v43 = vld [vmem:[%s1096_s0 + $0x28] sm:$0xff]  ;;  %v53_v46 = vld [vmem:[%s1096_s0 + $0x30] sm:$0xff] }
  0x10   :  { %169 = vmatpush.msra.mxu2 %v631_v14  ;;  %71 = vmatpush.msra.mxu0 %v631_v14  ;;  %v479_v44 = vld [vmem:[%s1096_s0 + $0xa0] sm:$0xff]  ;;  %v480_v45 = vld [vmem:[%s1096_s0 + $0xa8] sm:$0xff]  ;;  %v54_v47 = vld [vmem:[%s1096_s0 + $0x38] sm:$0xff] }
  0x11   :  { %207 = vmatpush.msra.mxu3 %v637_v15  ;;  %109 = vmatpush.msra.mxu1 %v637_v15  ;;  %v481_v48 = vld [vmem:[%s1096_s0 + $0xb0] sm:$0xff]  ;;  %v482_v49 = vld [vmem:[%s1096_s0 + $0xb8] sm:$0xff]  ;;  %v55_v50 = vld [vmem:[%s1096_s0 + $0x40] sm:$0xff] }
  0x12   :  { %170 = vmatpush.msra.mxu2 %v645_v16  ;;  %72 = vmatpush.msra.mxu0 %v645_v16  ;;  %v56_v51 = vld [vmem:[%s1096_s0 + $0x48] sm:$0xff]  ;;  %v483_v52 = vld [vmem:[%s1096_s0 + $0xc0] sm:$0xff]  ;;  %v57_v54 = vld [vmem:[%s1096_s0 + $0x50] sm:$0xff] }
  0x13   :  { %208 = vmatpush.msra.mxu3 %v651_v17  ;;  %110 = vmatpush.msra.mxu1 %v651_v17  ;;  %v484_v53 = vld [vmem:[%s1096_s0 + $0xc8] sm:$0xff]  ;;  %v58_v55 = vld [vmem:[%s1096_s0 + $0x58] sm:$0xff]  ;;  %v485_v56 = vld [vmem:[%s1096_s0 + $0xd0] sm:$0x3] }
  0x14   :  { %171 = vmatpush.msra.mxu2 %v659_v18  ;;  %73 = vmatpush.msra.mxu0 %v659_v18  ;;  %v486_v57 = vld [vmem:[%s1096_s0 + $0xd8] sm:$0x3]  ;;  %v59_v58 = vld [vmem:[%s1096_s0 + $0x60] sm:$0x3]  ;;  %v60_v59 = vld [vmem:[%s1096_s0 + $0x68] sm:$0x3] }
  0x15   :  { %209 = vmatpush.msra.mxu3 %v665_v19  ;;  %111 = vmatpush.msra.mxu1 %v665_v19  ;;  %v501_v60 = vld [vmem:[%s1096_s0 + $0x150] sm:$0xff]  ;;  %v502_v61 = vld [vmem:[%s1096_s0 + $0x158] sm:$0xff]  ;;  %v487_v62 = vld [vmem:[%s1096_s0 + $0xe0] sm:$0xff] }
  0x16   :  { %172 = vmatpush.msra.mxu2 %v673_v20  ;;  %74 = vmatpush.msra.mxu0 %v673_v20  ;;  %v488_v63 = vld [vmem:[%s1096_s0 + $0xe8] sm:$0xff] }
  0x17   :  { %210 = vmatpush.msra.mxu3 %v679_v21  ;;  %112 = vmatpush.msra.mxu1 %v679_v21 }
  0x18   :  { %173 = vmatpush.msra.mxu2 %v687_v22  ;;  %75 = vmatpush.msra.mxu0 %v687_v22 }
  0x19   :  { %211 = vmatpush.msra.mxu3 %v693_v23  ;;  %113 = vmatpush.msra.mxu1 %v693_v23 }
  0x1a   :  { %174 = vmatpush.msra.mxu2 %v701_v24  ;;  %76 = vmatpush.msra.mxu0 %v701_v24 }
  0x1b   :  { %212 = vmatpush.msra.mxu3 %v707_v25  ;;  %114 = vmatpush.msra.mxu1 %v707_v25 }
  0x1c   :  { %175 = vmatpush.msra.mxu2 %v715_v26  ;;  %77 = vmatpush.msra.mxu0 %v715_v26 }
  0x1d   :  { %213 = vmatpush.msra.mxu3 %v721_v27  ;;  %115 = vmatpush.msra.mxu1 %v721_v27 }
  0x1e   :  { %176 = vmatpush.msra.mxu2 %v729_v28  ;;  %78 = vmatpush.msra.mxu0 %v729_v28 }
  0x1f   :  { %214 = vmatpush.msra.mxu3 %v735_v29  ;;  %116 = vmatpush.msra.mxu1 %v735_v29 }
  0x20   :  { %177 = vmatpush.msra.mxu2 %v743_v30  ;;  %79 = vmatpush.msra.mxu0 %v743_v30 }
  0x21   :  { %215 = vmatpush.msra.mxu3 %v749_v31  ;;  %178 = vmatmul.f32.vlgmr.msra.gmra.mxu2 %v473_v32 }
  0x22   :  { %216 = vmatmul.f32.vlgmr.msra.gmra.mxu3 %v474_v33  ;;  %365 = vmatpush.msrb.mxu2 %v539_v0 }
  0x23   :  { %403 = vmatpush.msrb.mxu3 %v549_v2  ;;  %117 = vmatpush.msra.mxu1 %v749_v31 }
  0x24   :  { %366 = vmatpush.msrb.mxu2 %v544_v1  ;;  %80 = vmatmul.f32.vlgmr.msra.gmra.mxu0 %v47_v34 }
  0x25   :  { %267 = vmatpush.msrb.mxu0 %v539_v0  ;;  %404 = vmatpush.msrb.mxu3 %v556_v3  ;;  %v503_v0 = vld [vmem:[%s1096_s0 + $0x160] sm:$0xff] }
  0x26   :  { %367 = vmatpush.msrb.mxu2 %v561_v4  ;;  %118 = vmatmul.f32.vlgmr.msra.gmra.mxu1 %v48_v35 }
  0x27   :  { %305 = vmatpush.msrb.mxu1 %v549_v2  ;;  %405 = vmatpush.msrb.mxu3 %v567_v5  ;;  %v489_v2 = vld [vmem:[%s1096_s0 + $0xf0] sm:$0xff] }
  0x28   :  { %268 = vmatpush.msrb.mxu0 %v544_v1  ;;  %368 = vmatpush.msrb.mxu2 %v575_v6  ;;  %v504_v1 = vld [vmem:[%s1096_s0 + $0x168] sm:$0xff] }
  0x29   :  { %181 = vmatmul.f32.gmra.mxu2 %v475_v36  ;;  %306 = vmatpush.msrb.mxu1 %v556_v3  ;;  %v490_v3 = vld [vmem:[%s1096_s0 + $0xf8] sm:$0xff] }
  0x2a   :  { %219 = vmatmul.f32.gmra.mxu3 %v476_v37  ;;  %269 = vmatpush.msrb.mxu0 %v561_v4  ;;  %v505_v4 = vld [vmem:[%s1096_s0 + $0x170] sm:$0xff] }
  0x2b   :  { %406 = vmatpush.msrb.mxu3 %v581_v7  ;;  %369 = vmatpush.msrb.mxu2 %v589_v8 }
  0x2c   :  { %83 = vmatmul.f32.gmra.mxu0 %v49_v38  ;;  %307 = vmatpush.msrb.mxu1 %v567_v5  ;;  %v506_v5 = vld [vmem:[%s1096_s0 + $0x178] sm:$0xff] }
  0x2d   :  { %407 = vmatpush.msrb.mxu3 %v595_v9  ;;  %270 = vmatpush.msrb.mxu0 %v575_v6  ;;  %v491_v6 = vld [vmem:[%s1096_s0 + $0x100] sm:$0xff] }
  0x2e   :  { %121 = vmatmul.f32.gmra.mxu1 %v50_v39  ;;  %370 = vmatpush.msrb.mxu2 %v603_v10 }
  0x2f   :  { %308 = vmatpush.msrb.mxu1 %v581_v7  ;;  %271 = vmatpush.msrb.mxu0 %v589_v8  ;;  %v492_v7 = vld [vmem:[%s1096_s0 + $0x108] sm:$0xff]  ;;  %v507_v8 = vld [vmem:[%s1096_s0 + $0x180] sm:$0xff] }
  0x30   :  { %408 = vmatpush.msrb.mxu3 %v609_v11  ;;  %371 = vmatpush.msrb.mxu2 %v617_v12 }
  0x31   :  { %184 = vmatmul.f32.gmra.mxu2 %v477_v40  ;;  %309 = vmatpush.msrb.mxu1 %v595_v9  ;;  %v508_v9 = vld [vmem:[%s1096_s0 + $0x188] sm:$0xff] }
  0x32   :  { %222 = vmatmul.f32.gmra.mxu3 %v478_v41  ;;  %272 = vmatpush.msrb.mxu0 %v603_v10  ;;  %v493_v10 = vld [vmem:[%s1096_s0 + $0x110] sm:$0xff] }
  0x33   :  { %409 = vmatpush.msrb.mxu3 %v623_v13  ;;  %372 = vmatpush.msrb.mxu2 %v631_v14 }
  0x34   :  { %86 = vmatmul.f32.gmra.mxu0 %v51_v42  ;;  %310 = vmatpush.msrb.mxu1 %v609_v11  ;;  %v494_v11 = vld [vmem:[%s1096_s0 + $0x118] sm:$0xff] }
  0x35   :  { %273 = vmatpush.msrb.mxu0 %v617_v12  ;;  %410 = vmatpush.msrb.mxu3 %v637_v15  ;;  %v509_v12 = vld [vmem:[%s1096_s0 + $0x190] sm:$0xff] }
  0x36   :  { %124 = vmatmul.f32.gmra.mxu1 %v52_v43  ;;  %373 = vmatpush.msrb.mxu2 %v645_v16 }
  0x37   :  { %311 = vmatpush.msrb.mxu1 %v623_v13  ;;  %411 = vmatpush.msrb.mxu3 %v651_v17  ;;  %v510_v13 = vld [vmem:[%s1096_s0 + $0x198] sm:$0xff] }
  0x38   :  { %274 = vmatpush.msrb.mxu0 %v631_v14  ;;  %374 = vmatpush.msrb.mxu2 %v659_v18  ;;  %v495_v14 = vld [vmem:[%s1096_s0 + $0x120] sm:$0xff] }
  0x39   :  { %187 = vmatmul.f32.gmra.mxu2 %v479_v44  ;;  %312 = vmatpush.msrb.mxu1 %v637_v15  ;;  %v496_v15 = vld [vmem:[%s1096_s0 + $0x128] sm:$0xff] }
  0x3a   :  { %225 = vmatmul.f32.gmra.mxu3 %v480_v45  ;;  %275 = vmatpush.msrb.mxu0 %v645_v16  ;;  %v511_v16 = vld [vmem:[%s1096_s0 + $0x1a0] sm:$0xff] }
  0x3b   :  { %412 = vmatpush.msrb.mxu3 %v665_v19  ;;  %375 = vmatpush.msrb.mxu2 %v673_v20 }
  0x3c   :  { %89 = vmatmul.f32.gmra.mxu0 %v53_v46  ;;  %313 = vmatpush.msrb.mxu1 %v651_v17  ;;  %v512_v17 = vld [vmem:[%s1096_s0 + $0x1a8] sm:$0xff] }
  0x3d   :  { %413 = vmatpush.msrb.mxu3 %v679_v21  ;;  %276 = vmatpush.msrb.mxu0 %v659_v18  ;;  %v497_v18 = vld [vmem:[%s1096_s0 + $0x130] sm:$0xff] }
  0x3e   :  { %127 = vmatmul.f32.gmra.mxu1 %v54_v47  ;;  %376 = vmatpush.msrb.mxu2 %v687_v22 }
  0x3f   :  { %314 = vmatpush.msrb.mxu1 %v665_v19  ;;  %277 = vmatpush.msrb.mxu0 %v673_v20  ;;  %v498_v19 = vld [vmem:[%s1096_s0 + $0x138] sm:$0xff]  ;;  %v513_v20 = vld [vmem:[%s1096_s0 + $0x1b0] sm:$0x3] }
  0x40   :  { %414 = vmatpush.msrb.mxu3 %v693_v23  ;;  %377 = vmatpush.msrb.mxu2 %v701_v24 }
  0x41   :  { %190 = vmatmul.f32.gmra.mxu2 %v481_v48  ;;  %315 = vmatpush.msrb.mxu1 %v679_v21  ;;  %v514_v21 = vld [vmem:[%s1096_s0 + $0x1b8] sm:$0x3] }
  0x42   :  { %228 = vmatmul.f32.gmra.mxu3 %v482_v49  ;;  %278 = vmatpush.msrb.mxu0 %v687_v22  ;;  %v499_v22 = vld [vmem:[%s1096_s0 + $0x140] sm:$0x3] }
  0x43   :  { %415 = vmatpush.msrb.mxu3 %v707_v25  ;;  %378 = vmatpush.msrb.mxu2 %v715_v26  ;;  %v1021_v49 = vld [vmem:[%s1095_s2] ss:$0 sm:$0xff] }
  0x44   :  { %92 = vmatmul.f32.gmra.mxu0 %v55_v50  ;;  %316 = vmatpush.msrb.mxu1 %v693_v23  ;;  %v500_v23 = vld [vmem:[%s1096_s0 + $0x148] sm:$0x3] }
  0x45   :  { %279 = vmatpush.msrb.mxu0 %v701_v24  ;;  %416 = vmatpush.msrb.mxu3 %v721_v27 }
  0x46   :  { %130 = vmatmul.f32.gmra.mxu1 %v56_v51  ;;  %379 = vmatpush.msrb.mxu2 %v729_v28 }
  0x47   :  { %317 = vmatpush.msrb.mxu1 %v707_v25  ;;  %417 = vmatpush.msrb.mxu3 %v735_v29 }
  0x48   :  { %280 = vmatpush.msrb.mxu0 %v715_v26  ;;  %380 = vmatpush.msrb.mxu2 %v743_v30 }
  0x49   :  { %193 = vmatmul.f32.gmra.mxu2 %v483_v52  ;;  %318 = vmatpush.msrb.mxu1 %v721_v27 }
  0x4a   :  { %231 = vmatmul.f32.gmra.mxu3 %v484_v53  ;;  %281 = vmatpush.msrb.mxu0 %v729_v28 }
  0x4b   :  { %418 = vmatpush.msrb.mxu3 %v749_v31  ;;  %319 = vmatpush.msrb.mxu1 %v735_v29 }
  0x4c   :  { %95 = vmatmul.f32.gmra.mxu0 %v57_v54 }
  0x4d   :  { %282 = vmatpush.msrb.mxu0 %v743_v30  ;;  %320 = vmatpush.msrb.mxu1 %v749_v31 }
  0x4e   :  { %133 = vmatmul.f32.gmra.mxu1 %v58_v55 }
  0x51   :  { %196 = vmatmul.f32.gmra.mxu2 %v485_v56 }
  0x52   :  { %234 = vmatmul.f32.gmra.mxu3 %v486_v57 }
  0x54   :  { %98 = vmatmul.f32.gmra.mxu0 %v59_v58 }
  0x56   :  { %136 = vmatmul.f32.gmra.mxu1 %v60_v59 }
  0x59   :  { %381 = vmatmul.f32.vlgmr.msrb.gmra.mxu2 %v501_v60 }
  0x5a   :  { %419 = vmatmul.f32.vlgmr.msrb.gmra.mxu3 %v502_v61 }
  0x5c   :  { %283 = vmatmul.f32.vlgmr.msrb.gmra.mxu0 %v487_v62 }
  0x5e   :  { %321 = vmatmul.f32.vlgmr.msrb.gmra.mxu1 %v488_v63 }
  0x61   :  { %384 = vmatmul.f32.gmra.mxu2 %v503_v0 }
  0x62   :  { %422 = vmatmul.f32.gmra.mxu3 %v504_v1 }
  0x64   :  { %286 = vmatmul.f32.gmra.mxu0 %v489_v2 }
  0x66   :  { %324 = vmatmul.f32.gmra.mxu1 %v490_v3 }
  0x69   :  { %387 = vmatmul.f32.gmra.mxu2 %v505_v4 }
  0x6a   :  { %425 = vmatmul.f32.gmra.mxu3 %v506_v5 }
  0x6c   :  { %289 = vmatmul.f32.gmra.mxu0 %v491_v6 }
  0x6e   :  { %327 = vmatmul.f32.gmra.mxu1 %v492_v7 }
  0x71   :  { %390 = vmatmul.f32.gmra.mxu2 %v507_v8 }
  0x72   :  { %428 = vmatmul.f32.gmra.mxu3 %v508_v9 }
  0x74   :  { %292 = vmatmul.f32.gmra.mxu0 %v493_v10 }
  0x76   :  { %330 = vmatmul.f32.gmra.mxu1 %v494_v11 }
  0x79   :  { %393 = vmatmul.f32.gmra.mxu2 %v509_v12 }
  0x7a   :  { %431 = vmatmul.f32.gmra.mxu3 %v510_v13 }
  0x7c   :  { %295 = vmatmul.f32.gmra.mxu0 %v495_v14 }
  0x7e   :  { %333 = vmatmul.f32.gmra.mxu1 %v496_v15 }
  0x81   :  { %396 = vmatmul.f32.gmra.mxu2 %v511_v16 }
  0x82   :  { %434 = vmatmul.f32.gmra.mxu3 %v512_v17 }
  0x84   :  { %298 = vmatmul.f32.gmra.mxu0 %v497_v18 }
  0x86   :  { %336 = vmatmul.f32.gmra.mxu1 %v498_v19 }
  0x89   :  { %399 = vmatmul.f32.gmra.mxu2 %v513_v20 }
  0x8a   :  { %437 = vmatmul.f32.gmra.mxu3 %v514_v21 }
  0x8c   :  { %301 = vmatmul.f32.gmra.mxu0 %v499_v22 }
  0x8e   :  { %339 = vmatmul.f32.gmra.mxu1 %v500_v23 }
  0xa1   :  { %v81_v24 = vpop.f32.mrf.mxu0 }
  0xa2   :  { %v82_v53 = vadd.f32 %v1021_v49, %v81_v24 }
  0xa3   :  { %v119_v25 = vpop.f32.mrf.mxu1 }
  0xa4   :  { %v179_v26 = vpop.f32.mrf.mxu2  ;;  %v120_v57 = vadd.f32 %v119_v25, %v82_v53 }
  0xa5   :  { %v217_v27 = vpop.f32.mrf.mxu3  ;;  %v180_v54 = vadd.f32 %v1021_v49, %v179_v26 }
  0xa6   :  { %v140_v2 = vmax.f32 %v120_v57, 0.0 }
  0xa7   :  { %v218_v58 = vadd.f32 %v217_v27, %v180_v54 }
  0xa9   :  { %v84_v28 = vpop.f32.mrf.mxu0  ;;  %v238_v3 = vmax.f32 %v218_v58, 0.0 }
  0xaa   :  { %v85_v0 = vadd.f32 %v1021_v49, %v84_v28 }
  0xab   :  { %v122_v29 = vpop.f32.mrf.mxu1  ;;  %v245_v11 = vmax.f32 %v140_v2, %v238_v3 }
  0xac   :  { %v182_v30 = vpop.f32.mrf.mxu2  ;;  %v123_v8 = vadd.f32 %v122_v29, %v85_v0 }
  0xad   :  { %v220_v31 = vpop.f32.mrf.mxu3  ;;  %v183_v1 = vadd.f32 %v1021_v49, %v182_v30 }
  0xae   :  { %v141_v19 = vmax.f32 %v123_v8, 0.0 }
  0xaf   :  { %v221_v9 = vadd.f32 %v220_v31, %v183_v1 }
  0xb1   :  { %v87_v32 = vpop.f32.mrf.mxu0  ;;  %v239_v20 = vmax.f32 %v221_v9, 0.0 }
  0xb2   :  { %v88_v21 = vadd.f32 %v1021_v49, %v87_v32 }
  0xb3   :  { %v125_v33 = vpop.f32.mrf.mxu1  ;;  %v246_v28 = vmax.f32 %v141_v19, %v239_v20 }
  0xb4   :  { %v185_v34 = vpop.f32.mrf.mxu2  ;;  %v126_v29 = vadd.f32 %v125_v33, %v88_v21 }
  0xb5   :  { %v223_v35 = vpop.f32.mrf.mxu3  ;;  %v186_v22 = vadd.f32 %v1021_v49, %v185_v34 }
  0xb7   :  { %v224_v30 = vadd.f32 %v223_v35, %v186_v22 }
  0xb9   :  { %v992_v36 = vpop.f32.mrf.mxu0 }
  0xba   :  { %v91_v57 = vadd.f32 %v1021_v49, %v992_v36 }
  0xbb   :  { %v994_v37 = vpop.f32.mrf.mxu1 }
  0xbc   :  { %v996_v38 = vpop.f32.mrf.mxu2 }
  0xbd   :  { %v998_v39 = vpop.f32.mrf.mxu3  ;;  %v189_v58 = vadd.f32 %v1021_v49, %v996_v38 }
  0xbf   :  { %v227_v0 = vadd.f32 %v998_v39, %v189_v58 }
  0xc1   :  { %v1000_v40 = vpop.f32.mrf.mxu0  ;;  %v241_v9 = vmax.f32 %v227_v0, 0.0 }
  0xc3   :  { %v1002_v41 = vpop.f32.mrf.mxu1 }
  0xc4   :  { %v1004_v42 = vpop.f32.mrf.mxu2 }
  0xc5   :  { %v1006_v43 = vpop.f32.mrf.mxu3 }
  0xc9   :  { %v1008_v44 = vpop.f32.mrf.mxu0 }
  0xcb   :  { %v1010_v45 = vpop.f32.mrf.mxu1 }
  0xcc   :  { %v1012_v46 = vpop.f32.mrf.mxu2 }
  0xcd   :  { %v1014_v47 = vpop.f32.mrf.mxu3 }
  0xd1   :  { %v1016_v48 = vpop.f32.mrf.mxu0 }
  0xd3   :  { %v1023_v50 = vpop.f32.mrf.mxu1 }
  0xd4   :  { %v1025_v51 = vpop.f32.mrf.mxu2 }
  0xd5   :  { %v1027_v52 = vpop.f32.mrf.mxu3 }
  0xd9   :  { %v284_v55 = vpop.f32.mrf.mxu0 }
  0xda   :  { %v285_v56 = vadd.f32 %v1021_v49, %v284_v55 }
  0xdb   :  { %v322_v59 = vpop.f32.mrf.mxu1 }
  0xdc   :  { %v382_v60 = vpop.f32.mrf.mxu2  ;;  %v323_v61 = vadd.f32 %v322_v59, %v285_v56  ;;  %v142_v59 = vmax.f32 %v126_v29, 0.0 }
  0xdd   :  { %v420_v62 = vpop.f32.mrf.mxu3  ;;  %v383_v63 = vadd.f32 %v1021_v49, %v382_v60  ;;  %v240_v60 = vmax.f32 %v224_v30, 0.0 }
  0xde   :  { %v343_v4 = vmax.f32 %v323_v61, 0.0 }
  0xdf   :  { %v421_v5 = vadd.f32 %v420_v62, %v383_v63  ;;  %v129_v63 = vadd.f32 %v994_v37, %v91_v57  ;;  %v247_v36 = vmax.f32 %v142_v59, %v240_v60  ;;  %v192_v37 = vadd.f32 %v1021_v49, %v1004_v42 }
  0xe0   :  { %v100_v59 = vadd.f32 %v1021_v49, %v1016_v48 }
  0xe1   :  { %v441_v6 = vmax.f32 %v421_v5, 0.0  ;;  %v287_v7 = vpop.f32.mrf.mxu0  ;;  %v143_v8 = vmax.f32 %v129_v63, 0.0 }
  0xe2   :  { %v288_v10 = vadd.f32 %v1021_v49, %v287_v7  ;;  %v138_v63 = vadd.f32 %v1023_v50, %v100_v59 }
  0xe3   :  { %v448_v12 = vmax.f32 %v343_v4, %v441_v6  ;;  %v325_v13 = vpop.f32.mrf.mxu1 }
  0xe4   :  { %v385_v14 = vpop.f32.mrf.mxu2  ;;  %v326_v15 = vadd.f32 %v325_v13, %v288_v10  ;;  %v94_v10 = vadd.f32 %v1021_v49, %v1000_v40 }
  0xe5   :  { %v423_v16 = vpop.f32.mrf.mxu3  ;;  %v455_v17 = vmax.f32 %v245_v11, %v448_v12  ;;  %v386_v18 = vadd.f32 %v1021_v49, %v385_v14 }
  0xe6   :  { %v344_v23 = vmax.f32 %v326_v15, 0.0  ;;  %v248_v15 = vmax.f32 %v143_v8, %v241_v9 }
  0xe7   :  { %462 = vst [vmem:[%s1097_s3] sm:$0xff] %v455_v17  ;;  %v424_v24 = vadd.f32 %v423_v16, %v386_v18  ;;  %v132_v16 = vadd.f32 %v1002_v41, %v94_v10  ;;  %v230_v17 = vadd.f32 %v1006_v43, %v192_v37 }
  0xe9   :  { %v442_v25 = vmax.f32 %v424_v24, 0.0  ;;  %v290_v26 = vpop.f32.mrf.mxu0  ;;  %v195_v24 = vadd.f32 %v1021_v49, %v1012_v46 }
  0xea   :  { %v291_v27 = vadd.f32 %v1021_v49, %v290_v26  ;;  %v242_v26 = vmax.f32 %v230_v17, 0.0 }
  0xeb   :  { %v449_v31 = vmax.f32 %v344_v23, %v442_v25  ;;  %v328_v53 = vpop.f32.mrf.mxu1  ;;  %v97_v23 = vadd.f32 %v1021_v49, %v1008_v44  ;;  %v144_v25 = vmax.f32 %v132_v16, 0.0  ;;  %v233_v30 = vadd.f32 %v1014_v47, %v195_v24 }
  0xec   :  { %v388_v54 = vpop.f32.mrf.mxu2  ;;  %v329_v55 = vadd.f32 %v328_v53, %v291_v27 }
  0xed   :  { %v426_v32 = vpop.f32.mrf.mxu3  ;;  %v456_v56 = vmax.f32 %v246_v28, %v449_v31  ;;  %v389_v34 = vadd.f32 %v1021_v49, %v388_v54  ;;  %v135_v29 = vadd.f32 %v1010_v45, %v97_v23  ;;  %v249_v44 = vmax.f32 %v144_v25, %v242_v26 }
  0xee   :  { %v345_v33 = vmax.f32 %v329_v55, 0.0  ;;  %v243_v58 = vmax.f32 %v233_v30, 0.0  ;;  %v198_v45 = vadd.f32 %v1021_v49, %v1025_v51 }
  0xef   :  { %463 = vst [vmem:[%s1097_s3 + $0x8] sm:$0xff] %v456_v56  ;;  %v427_v35 = vadd.f32 %v426_v32, %v389_v34  ;;  %v145_v57 = vmax.f32 %v135_v29, 0.0 }
  0xf0   :  { %v236_v0 = vadd.f32 %v1027_v52, %v198_v45 }
  0xf1   :  { %v443_v61 = vmax.f32 %v427_v35, 0.0  ;;  %v293_v62 = vpop.f32.mrf.mxu0 }
  0xf2   :  { %v294_v1 = vadd.f32 %v1021_v49, %v293_v62  ;;  %v250_v62 = vmax.f32 %v145_v57, %v243_v58 }
  0xf3   :  { %v450_v2 = vmax.f32 %v345_v33, %v443_v61  ;;  %v331_v3 = vpop.f32.mrf.mxu1 }
  0xf4   :  { %v391_v38 = vpop.f32.mrf.mxu2  ;;  %v332_v4 = vadd.f32 %v331_v3, %v294_v1 }
  0xf5   :  { %v429_v5 = vpop.f32.mrf.mxu3  ;;  %v457_v6 = vmax.f32 %v247_v36, %v450_v2  ;;  %v392_v7 = vadd.f32 %v1021_v49, %v391_v38 }
  0xf6   :  { %v346_v39 = vmax.f32 %v332_v4, 0.0  ;;  %v146_v4 = vmax.f32 %v138_v63, 0.0 }
  0xf7   :  { %464 = vst [vmem:[%s1097_s3 + $0x10] sm:$0xff] %v457_v6  ;;  %v430_v11 = vadd.f32 %v429_v5, %v392_v7  ;;  %v244_v5 = vmax.f32 %v236_v0, 0.0 }
  0xf9   :  { %v444_v12 = vmax.f32 %v430_v11, 0.0  ;;  %v296_v13 = vpop.f32.mrf.mxu0  ;;  %v251_v50 = vmax.f32 %v146_v4, %v244_v5 }
  0xfa   :  { %v297_v14 = vadd.f32 %v1021_v49, %v296_v13 }
  0xfb   :  { %v451_v18 = vmax.f32 %v346_v39, %v444_v12  ;;  %v334_v40 = vpop.f32.mrf.mxu1 }
  0xfc   :  { %v394_v19 = vpop.f32.mrf.mxu2  ;;  %v335_v20 = vadd.f32 %v334_v40, %v297_v14 }
  0xfd   :  { %v432_v42 = vpop.f32.mrf.mxu3  ;;  %v458_v21 = vmax.f32 %v248_v15, %v451_v18  ;;  %v395_v22 = vadd.f32 %v1021_v49, %v394_v19 }
  0xfe   :  { %v347_v41 = vmax.f32 %v335_v20, 0.0 }
  0xff   :  { %465 = vst [vmem:[%s1097_s3 + $0x18] sm:$0xff] %v458_v21  ;;  %v433_v43 = vadd.f32 %v432_v42, %v395_v22 }
 0x101   :  { %v445_v27 = vmax.f32 %v433_v43, 0.0  ;;  %v299_v28 = vpop.f32.mrf.mxu0 }
 0x102   :  { %v300_v31 = vadd.f32 %v1021_v49, %v299_v28 }
 0x103   :  { %v452_v53 = vmax.f32 %v347_v41, %v445_v27  ;;  %v337_v54 = vpop.f32.mrf.mxu1 }
 0x104   :  { %v397_v46 = vpop.f32.mrf.mxu2  ;;  %v338_v55 = vadd.f32 %v337_v54, %v300_v31 }
 0x105   :  { %v435_v32 = vpop.f32.mrf.mxu3  ;;  %v459_v56 = vmax.f32 %v249_v44, %v452_v53  ;;  %v398_v34 = vadd.f32 %v1021_v49, %v397_v46 }
 0x106   :  { %v348_v47 = vmax.f32 %v338_v55, 0.0 }
 0x107   :  { %466 = vst [vmem:[%s1097_s3 + $0x20] sm:$0xff] %v459_v56  ;;  %v436_v60 = vadd.f32 %v435_v32, %v398_v34 }
 0x109   :  { %v446_v33 = vmax.f32 %v436_v60, 0.0  ;;  %v302_v35 = vpop.f32.mrf.mxu0 }
 0x10a   :  { %v303_v61 = vadd.f32 %v1021_v49, %v302_v35 }
 0x10b   :  { %v453_v1 = vmax.f32 %v348_v47, %v446_v33  ;;  %v340_v48 = vpop.f32.mrf.mxu1 }
 0x10c   :  { %v400_v36 = vpop.f32.mrf.mxu2  ;;  %v341_v2 = vadd.f32 %v340_v48, %v303_v61 }
 0x10d   :  { %v438_v51 = vpop.f32.mrf.mxu3  ;;  %v460_v3 = vmax.f32 %v250_v62, %v453_v1  ;;  %v401_v38 = vadd.f32 %v1021_v49, %v400_v36 }
 0x10e   :  { %v349_v6 = vmax.f32 %v341_v2, 0.0 }
 0x10f   :  { %467 = vst [vmem:[%s1097_s3 + $0x28] sm:$0xff] %v460_v3  ;;  %v439_v7 = vadd.f32 %v438_v51, %v401_v38 }
 0x111   :  { %v447_v8 = vmax.f32 %v439_v7, 0.0 }
 0x113   :  { %v454_v9 = vmax.f32 %v349_v6, %v447_v8 }
 0x115   :  { %v461_v52 = vmax.f32 %v251_v50, %v454_v9 }
 0x117   :  { %468 = vst [vmem:[%s1097_s3 + $0x30] sm:$0x3] %v461_v52 }

// kernel: cifar10_cnn_forward.5
= control target key start
LH: loop header
LB: loop body
LE: loop exit
PB: predicated region body
PF: predicated region fallthrough
CT: control target
= control target key end

     0   :  { %s659_s0 = inlined_call_operand.vmem [shape: f32[2,512], index: 0, kind: input, shape index: {}]   ;;  %s660_s1 = inlined_call_operand.vmem [shape: f32[512,128], index: 1, kind: input, shape index: {}]   ;;  %s661_s2 = inlined_call_operand.vmem [shape: f32[1,128], index: 2, kind: input, shape index: {}]   ;;  %s662_s3 = inlined_call_operand.vmem [shape: f32[128,128], index: 3, kind: input, shape index: {}]   ;;  %s663_s4 = inlined_call_operand.vmem [shape: f32[1,128], index: 4, kind: input, shape index: {}]   ;;  %s664_s5 = inlined_call_operand.vmem [shape: f32[128,128], index: 5, kind: input, shape index: {}]   ;;  %s665_s6 = inlined_call_operand.vmem [shape: f32[1,128], index: 6, kind: input, shape index: {}]   ;;  %s666_s7 = inlined_call_operand.hbm [shape: f32[2,128], index: 7, kind: output, shape index: {}]  }
   0x1   :  { %v75_v0 = vld [vmem:[%s660_s1 + $0x178] sm:$0xff]  ;;  %v74_v2 = vld [vmem:[%s660_s1 + $0x170] sm:$0xff]  ;;  %v73_v6 = vld [vmem:[%s660_s1 + $0x168] sm:$0xff] }
   0x2   :  { %v43_v1 = vld [vmem:[%s660_s1 + $0x78] sm:$0xff]  ;;  %146 = vmatpush.msra.mxu2 %v75_v0  ;;  %v42_v4 = vld [vmem:[%s660_s1 + $0x70] sm:$0xff]  ;;  %v41_v8 = vld [vmem:[%s660_s1 + $0x68] sm:$0xff] }
   0x3   :  { %106 = vmatpush.msra.mxu0 %v43_v1  ;;  %v91_v3 = vld [vmem:[%s660_s1 + $0x1f8] sm:$0xff]  ;;  %v90_v7 = vld [vmem:[%s660_s1 + $0x1f0] sm:$0xff]  ;;  %v89_v10 = vld [vmem:[%s660_s1 + $0x1e8] sm:$0xff] }
   0x4   :  { %v59_v5 = vld [vmem:[%s660_s1 + $0xf8] sm:$0xff]  ;;  %166 = vmatpush.msra.mxu3 %v91_v3  ;;  %147 = vmatpush.msra.mxu2 %v74_v2  ;;  %v58_v9 = vld [vmem:[%s660_s1 + $0xf0] sm:$0xff]  ;;  %v72_v11 = vld [vmem:[%s660_s1 + $0x160] sm:$0xff] }
   0x5   :  { %126 = vmatpush.msra.mxu1 %v59_v5  ;;  %107 = vmatpush.msra.mxu0 %v42_v4  ;;  %v40_v12 = vld [vmem:[%s660_s1 + $0x60] sm:$0xff]  ;;  %v57_v13 = vld [vmem:[%s660_s1 + $0xe8] sm:$0xff]  ;;  %v71_v16 = vld [vmem:[%s660_s1 + $0x158] sm:$0xff] }
   0x6   :  { %167 = vmatpush.msra.mxu3 %v90_v7  ;;  %148 = vmatpush.msra.mxu2 %v73_v6  ;;  %v88_v14 = vld [vmem:[%s660_s1 + $0x1e0] sm:$0xff]  ;;  %v39_v17 = vld [vmem:[%s660_s1 + $0x58] sm:$0xff]  ;;  %v70_v20 = vld [vmem:[%s660_s1 + $0x150] sm:$0xff] }
   0x7   :  { %127 = vmatpush.msra.mxu1 %v58_v9  ;;  %108 = vmatpush.msra.mxu0 %v41_v8  ;;  %v56_v15 = vld [vmem:[%s660_s1 + $0xe0] sm:$0xff]  ;;  %v87_v18 = vld [vmem:[%s660_s1 + $0x1d8] sm:$0xff]  ;;  %v38_v21 = vld [vmem:[%s660_s1 + $0x50] sm:$0xff] }
   0x8   :  { %168 = vmatpush.msra.mxu3 %v89_v10  ;;  %149 = vmatpush.msra.mxu2 %v72_v11  ;;  %v55_v19 = vld [vmem:[%s660_s1 + $0xd8] sm:$0xff]  ;;  %v86_v22 = vld [vmem:[%s660_s1 + $0x1d0] sm:$0xff]  ;;  %v69_v24 = vld [vmem:[%s660_s1 + $0x148] sm:$0xff] }
   0x9   :  { %128 = vmatpush.msra.mxu1 %v57_v13  ;;  %109 = vmatpush.msra.mxu0 %v40_v12  ;;  %v54_v23 = vld [vmem:[%s660_s1 + $0xd0] sm:$0xff]  ;;  %v37_v25 = vld [vmem:[%s660_s1 + $0x48] sm:$0xff]  ;;  %v68_v28 = vld [vmem:[%s660_s1 + $0x140] sm:$0xff] }
   0xa   :  { %169 = vmatpush.msra.mxu3 %v88_v14  ;;  %150 = vmatpush.msra.mxu2 %v71_v16  ;;  %v85_v26 = vld [vmem:[%s660_s1 + $0x1c8] sm:$0xff]  ;;  %v36_v29 = vld [vmem:[%s660_s1 + $0x40] sm:$0xff]  ;;  %v67_v32 = vld [vmem:[%s660_s1 + $0x138] sm:$0xff] }
   0xb   :  { %129 = vmatpush.msra.mxu1 %v56_v15  ;;  %110 = vmatpush.msra.mxu0 %v39_v17  ;;  %v53_v27 = vld [vmem:[%s660_s1 + $0xc8] sm:$0xff]  ;;  %v84_v30 = vld [vmem:[%s660_s1 + $0x1c0] sm:$0xff]  ;;  %v35_v33 = vld [vmem:[%s660_s1 + $0x38] sm:$0xff] }
   0xc   :  { %170 = vmatpush.msra.mxu3 %v87_v18  ;;  %151 = vmatpush.msra.mxu2 %v70_v20  ;;  %v52_v31 = vld [vmem:[%s660_s1 + $0xc0] sm:$0xff]  ;;  %v83_v34 = vld [vmem:[%s660_s1 + $0x1b8] sm:$0xff]  ;;  %v66_v36 = vld [vmem:[%s660_s1 + $0x130] sm:$0xff] }
   0xd   :  { %130 = vmatpush.msra.mxu1 %v55_v19  ;;  %111 = vmatpush.msra.mxu0 %v38_v21  ;;  %v51_v35 = vld [vmem:[%s660_s1 + $0xb8] sm:$0xff]  ;;  %v34_v37 = vld [vmem:[%s660_s1 + $0x30] sm:$0xff]  ;;  %v65_v40 = vld [vmem:[%s660_s1 + $0x128] sm:$0xff] }
   0xe   :  { %171 = vmatpush.msra.mxu3 %v86_v22  ;;  %152 = vmatpush.msra.mxu2 %v69_v24  ;;  %v82_v38 = vld [vmem:[%s660_s1 + $0x1b0] sm:$0xff]  ;;  %v33_v41 = vld [vmem:[%s660_s1 + $0x28] sm:$0xff]  ;;  %v64_v44 = vld [vmem:[%s660_s1 + $0x120] sm:$0xff] }
   0xf   :  { %131 = vmatpush.msra.mxu1 %v54_v23  ;;  %112 = vmatpush.msra.mxu0 %v37_v25  ;;  %v50_v39 = vld [vmem:[%s660_s1 + $0xb0] sm:$0xff]  ;;  %v81_v42 = vld [vmem:[%s660_s1 + $0x1a8] sm:$0xff]  ;;  %v32_v45 = vld [vmem:[%s660_s1 + $0x20] sm:$0xff] }
  0x10   :  { %172 = vmatpush.msra.mxu3 %v85_v26  ;;  %153 = vmatpush.msra.mxu2 %v68_v28  ;;  %v49_v43 = vld [vmem:[%s660_s1 + $0xa8] sm:$0xff]  ;;  %v27_v46 = vld [vmem:[%s659_s0] sm:$0xff]  ;;  %v63_v49 = vld [vmem:[%s660_s1 + $0x118] sm:$0xff] }
  0x11   :  { %132 = vmatpush.msra.mxu1 %v53_v27  ;;  %113 = vmatpush.msra.mxu0 %v36_v29  ;;  %v80_v47 = vld [vmem:[%s660_s1 + $0x1a0] sm:$0xff]  ;;  %97 = vst [vmem:[#allocation1] ss:$4 sm:$0xff] %v27_v46  ;;  %v31_v50 = vld [vmem:[%s660_s1 + $0x18] sm:$0xff]  ;;  %v62_v51 = vld [vmem:[%s660_s1 + $0x110] sm:$0xff] }
  0x12   :  { %173 = vmatpush.msra.mxu3 %v84_v30  ;;  %154 = vmatpush.msra.mxu2 %v67_v32  ;;  %v48_v48 = vld [vmem:[%s660_s1 + $0xa0] sm:$0xff]  ;;  %v79_v52 = vld [vmem:[%s660_s1 + $0x198] sm:$0xff]  ;;  %v30_v54 = vld [vmem:[%s660_s1 + $0x10] sm:$0xff] }
  0x13   :  { %133 = vmatpush.msra.mxu1 %v52_v31  ;;  %114 = vmatpush.msra.mxu0 %v35_v33  ;;  %v47_v53 = vld [vmem:[%s660_s1 + $0x98] sm:$0xff]  ;;  %v61_v55 = vld [vmem:[%s660_s1 + $0x108] sm:$0xff]  ;;  %v78_v56 = vld [vmem:[%s660_s1 + $0x190] sm:$0xff] }
  0x14   :  { %174 = vmatpush.msra.mxu3 %v83_v34  ;;  %155 = vmatpush.msra.mxu2 %v66_v36  ;;  %v46_v57 = vld [vmem:[%s660_s1 + $0x90] sm:$0xff]  ;;  %v29_v58 = vld [vmem:[%s660_s1 + $0x8] sm:$0xff] }
  0x15   :  { %134 = vmatpush.msra.mxu1 %v51_v35  ;;  %115 = vmatpush.msra.mxu0 %v34_v37 }
  0x16   :  { %175 = vmatpush.msra.mxu3 %v82_v38  ;;  %156 = vmatpush.msra.mxu2 %v65_v40 }
  0x17   :  { %135 = vmatpush.msra.mxu1 %v50_v39  ;;  %116 = vmatpush.msra.mxu0 %v33_v41 }
  0x18   :  { %176 = vmatpush.msra.mxu3 %v81_v42  ;;  %157 = vmatpush.msra.mxu2 %v64_v44 }
  0x19   :  { %136 = vmatpush.msra.mxu1 %v49_v43  ;;  %117 = vmatpush.msra.mxu0 %v32_v45 }
  0x1a   :  { %177 = vmatpush.msra.mxu3 %v80_v47  ;;  %158 = vmatpush.msra.mxu2 %v63_v49 }
  0x1b   :  { %137 = vmatpush.msra.mxu1 %v48_v48  ;;  %118 = vmatpush.msra.mxu0 %v31_v50 }
  0x1c   :  { %178 = vmatpush.msra.mxu3 %v79_v52 }
  0x1d   :  { %138 = vmatpush.msra.mxu1 %v47_v53 }
  0x1e   :  { %12 = vsyncpa [#allocation3], 0  ;;  %159 = vmatpush.msra.mxu2 %v62_v51  ;;  %119 = vmatpush.msra.mxu0 %v30_v54  ;;  %v77_v59 = vld [vmem:[%s660_s1 + $0x188] sm:$0xff]  ;;  %v60_v61 = vld [vmem:[%s660_s1 + $0x100] sm:$0xff]  ;;  %s315_s30 = smov [#allocation2]   ;;  %s276_s0 = sshll.u32 %s666_s7, 4  ;;  %s277_s0 = int_to_ptr.hbm [resolvable:$true] %s276_s0 }
  0x1f   :  { %v45_v60 = vld [vmem:[%s660_s1 + $0x88] sm:$0xff]  ;;  %179 = vmatpush.msra.mxu3 %v78_v56  ;;  %139 = vmatpush.msra.mxu1 %v46_v57  ;;  %v28_v62 = vld [vmem:[%s660_s1] sm:$0xff]  ;;  %v100_v63 = vld.sshfl [vmem:[#allocation1 + $0x10] sm:$0xff pattern:$0x73625140]  ;;  %s274_s8 = sshll.u32 %s315_s30, 4  ;;  %s275_s8 = int_to_ptr.vmem [resolvable:$true] %s274_s8 }
  0x20   :  { %160 = vmatpush.msra.mxu2 %v61_v55  ;;  %120 = vmatpush.msra.mxu0 %v29_v58  ;;  %v76_v0 = vld [vmem:[%s660_s1 + $0x180] sm:$0xff]  ;;  %v101_v2 = vld.sshfl [vmem:[#allocation1 + $0x18] sm:$0xff pattern:$0x73625140]  ;;  %v201_v6 = vld [vmem:[%s662_s3 + $0x70] sm:$0xff] }
  0x21   :  { %180 = vmatpush.msra.mxu3 %v77_v59  ;;  %140 = vmatpush.msra.mxu1 %v45_v60  ;;  %v98_v1 = vld.sshfl [vmem:[#allocation1] sm:$0xff pattern:$0x73625140]  ;;  %v202_v4 = vld [vmem:[%s662_s3 + $0x78] sm:$0xff]  ;;  %v200_v7 = vld [vmem:[%s662_s3 + $0x68] sm:$0xff] }
  0x22   :  { %161 = vmatpush.msra.mxu2 %v60_v61  ;;  %121 = vmatpush.msra.mxu0 %v28_v62  ;;  %v44_v3 = vld [vmem:[%s660_s1 + $0x80] sm:$0xff]  ;;  %v99_v5 = vld.sshfl [vmem:[#allocation1 + $0x8] sm:$0xff pattern:$0x73625140]  ;;  %v198_v9 = vld [vmem:[%s662_s3 + $0x58] sm:$0xff] }
  0x23   :  { %162 = vmatmul.f32.vlgmr.msra.gmra.mxu2 %v100_v63  ;;  %181 = vmatpush.msra.mxu3 %v76_v0  ;;  %v199_v8 = vld [vmem:[%s662_s3 + $0x60] sm:$0xff]  ;;  %v197_v10 = vld [vmem:[%s662_s3 + $0x50] sm:$0xff]  ;;  %v196_v11 = vld [vmem:[%s662_s3 + $0x48] sm:$0xff] }
  0x24   :  { %122 = vmatmul.f32.vlgmr.msra.gmra.mxu0 %v98_v1  ;;  %182 = vmatmul.f32.vlgmr.msra.gmra.mxu3 %v101_v2  ;;  %v195_v12 = vld [vmem:[%s662_s3 + $0x40] sm:$0xff]  ;;  %v194_v13 = vld [vmem:[%s662_s3 + $0x38] sm:$0xff]  ;;  %v193_v14 = vld [vmem:[%s662_s3 + $0x30] sm:$0xff] }
  0x25   :  { %141 = vmatpush.msra.mxu1 %v44_v3  ;;  %207 = vmatpush.msrb.mxu0 %v202_v4  ;;  %v192_v15 = vld [vmem:[%s662_s3 + $0x28] sm:$0xff]  ;;  %v191_v16 = vld [vmem:[%s662_s3 + $0x20] sm:$0xff]  ;;  %v190_v17 = vld [vmem:[%s662_s3 + $0x18] sm:$0xff] }
  0x26   :  { %142 = vmatmul.f32.vlgmr.msra.gmra.mxu1 %v99_v5  ;;  %v189_v18 = vld [vmem:[%s662_s3 + $0x10] sm:$0xff]  ;;  %v188_v19 = vld [vmem:[%s662_s3 + $0x8] sm:$0xff]  ;;  %v187_v20 = vld [vmem:[%s662_s3] sm:$0xff] }
  0x27   :  { %208 = vmatpush.msrb.mxu0 %v201_v6  ;;  %v243_v21 = vld [vmem:[%s664_s5 + $0x78] sm:$0xff]  ;;  %v242_v22 = vld [vmem:[%s664_s5 + $0x70] sm:$0xff]  ;;  %v241_v23 = vld [vmem:[%s664_s5 + $0x68] sm:$0xff] }
  0x28   :  { %248 = vmatpush.msrb.mxu1 %v243_v21  ;;  %v240_v24 = vld [vmem:[%s664_s5 + $0x60] sm:$0xff]  ;;  %v239_v25 = vld [vmem:[%s664_s5 + $0x58] sm:$0xff]  ;;  %v238_v26 = vld [vmem:[%s664_s5 + $0x50] sm:$0xff] }
  0x29   :  { %209 = vmatpush.msrb.mxu0 %v200_v7  ;;  %v237_v27 = vld [vmem:[%s664_s5 + $0x48] sm:$0xff]  ;;  %v236_v28 = vld [vmem:[%s664_s5 + $0x40] sm:$0xff]  ;;  %v235_v29 = vld [vmem:[%s664_s5 + $0x38] sm:$0xff] }
  0x2a   :  { %249 = vmatpush.msrb.mxu1 %v242_v22  ;;  %v234_v30 = vld [vmem:[%s664_s5 + $0x30] sm:$0xff]  ;;  %v286_v31 = vld [vmem:[%s661_s2] ss:$0 sm:$0xff]  ;;  %v233_v32 = vld [vmem:[%s664_s5 + $0x28] sm:$0xff] }
  0x2b   :  { %210 = vmatpush.msrb.mxu0 %v199_v8  ;;  %v232_v34 = vld [vmem:[%s664_s5 + $0x20] sm:$0xff]  ;;  %v231_v37 = vld [vmem:[%s664_s5 + $0x18] sm:$0xff]  ;;  %v230_v44 = vld [vmem:[%s664_s5 + $0x10] sm:$0xff] }
  0x2c   :  { %250 = vmatpush.msrb.mxu1 %v241_v23  ;;  %v229_v45 = vld [vmem:[%s664_s5 + $0x8] sm:$0xff]  ;;  %v228_v46 = vld [vmem:[%s664_s5] sm:$0xff] }
  0x2d   :  { %211 = vmatpush.msrb.mxu0 %v198_v9  ;;  %v287_v47 = vld [vmem:[%s663_s4] ss:$0 sm:$0xff] }
  0x2e   :  { %251 = vmatpush.msrb.mxu1 %v240_v24  ;;  %v288_v51 = vld [vmem:[%s665_s6] ss:$0 sm:$0xff] }
  0x2f   :  { %212 = vmatpush.msrb.mxu0 %v197_v10 }
  0x30   :  { %252 = vmatpush.msrb.mxu1 %v239_v25 }
  0x31   :  { %213 = vmatpush.msrb.mxu0 %v196_v11 }
  0x32   :  { %253 = vmatpush.msrb.mxu1 %v238_v26 }
  0x33   :  { %214 = vmatpush.msrb.mxu0 %v195_v12 }
  0x34   :  { %254 = vmatpush.msrb.mxu1 %v237_v27 }
  0x35   :  { %215 = vmatpush.msrb.mxu0 %v194_v13 }
  0x36   :  { %255 = vmatpush.msrb.mxu1 %v236_v28 }
  0x37   :  { %216 = vmatpush.msrb.mxu0 %v193_v14 }
  0x38   :  { %256 = vmatpush.msrb.mxu1 %v235_v29 }
  0x39   :  { %217 = vmatpush.msrb.mxu0 %v192_v15 }
  0x3a   :  { %257 = vmatpush.msrb.mxu1 %v234_v30 }
  0x3b   :  { %218 = vmatpush.msrb.mxu0 %v191_v16 }
  0x3c   :  { %258 = vmatpush.msrb.mxu1 %v233_v32 }
  0x3d   :  { %219 = vmatpush.msrb.mxu0 %v190_v17 }
  0x3e   :  { %259 = vmatpush.msrb.mxu1 %v232_v34 }
  0x3f   :  { %220 = vmatpush.msrb.mxu0 %v189_v18 }
  0x40   :  { %260 = vmatpush.msrb.mxu1 %v231_v37 }
  0x41   :  { %221 = vmatpush.msrb.mxu0 %v188_v19 }
  0x42   :  { %261 = vmatpush.msrb.mxu1 %v230_v44 }
  0x43   :  { %222 = vmatpush.msrb.mxu0 %v187_v20 }
  0x44   :  { %262 = vmatpush.msrb.mxu1 %v229_v45 }
  0x46   :  { %263 = vmatpush.msrb.mxu1 %v228_v46 }
  0xa1   :  { %v123_v33 = vpop.f32.mrf.mxu0 }
  0xa2   :  { %v124_v35 = vadd.f32 %v286_v31, %v123_v33 }
  0xa3   :  { %v143_v36 = vpop.f32.mrf.mxu1 }
  0xa4   :  { %v144_v38 = vadd.f32 %v143_v36, %v124_v35 }
  0xa6   :  { %v163_v39 = vpop.f32.mrf.mxu2 }
  0xa7   :  { %v164_v40 = vadd.f32 %v163_v39, %v144_v38  ;;  %v183_v41 = vpop.f32.mrf.mxu3 }
  0xa9   :  { %v184_v42 = vadd.f32 %v183_v41, %v164_v40 }
  0xab   :  { %v186_v43 = vmax.f32 %v184_v42, 0.0 }
  0xad   :  { %223 = vmatmul.f32.vlgmr.msrb.gmra.mxu0 %v186_v43 }
 0x12a   :  { %v224_v48 = vpop.f32.mrf.mxu0 }
 0x12b   :  { %v225_v49 = vadd.f32 %v287_v47, %v224_v48 }
 0x12d   :  { %v227_v50 = vmax.f32 %v225_v49, 0.0 }
 0x12f   :  { %264 = vmatmul.f32.vlgmr.msrb.gmra.mxu1 %v227_v50 }
 0x1ac   :  { %v265_v52 = vpop.f32.mrf.mxu1 }
 0x1ad   :  { %v266_v53 = vadd.f32 %v288_v51, %v265_v52 }
 0x1af   :  { %268 = vst [vmem:[#allocation2] sm:$0x3] %v266_v53 }
 0x1b0   :  { %279 = dma.vmem_to_hbm [thread:$0]  %s275_s8, 32, %s277_s0, [#allocation3]  }
 0x1b1   :  { %313 = dma.done.wait [#allocation3], 32  }
 0x1b2   :  { %314 = vsyncadd [#allocation3], 4294967264 }
 0x1b3   :  { %284 = vsyncpa [#allocation3], 1 }

</bundles_post_ra>
